<compile_context>
chip_gen: v6e
topology: v6e:2x2x1
jax: 0.10.0
libtpu: 0.0.40
codegen_flags: <defaults>
</compile_context>

<pallas_src>
import functools

import jax
import jax.numpy as jnp
from jax.experimental import pallas as pl
from jax.experimental.pallas import tpu as pltpu


# ----------------------------- kernels -------------------------------------


def _mlp_kernel(x_ref, w1_ref, b1_ref, w2_ref, b2_ref, w3_ref, b3_ref, o_ref):
    # x arrives f32 (no wrapper cast); cast to bf16 here, accumulate in f32.
    x = x_ref[...].astype(jnp.bfloat16)
    # Layer 1: (TB, F_pad) @ (F_pad, 256) + b1, ReLU
    h1 = jnp.dot(x, w1_ref[...], preferred_element_type=jnp.float32)
    h1 = jnp.maximum(h1 + b1_ref[...], 0.0)
    # Layer 2: (TB, 256) @ (256, 128) + b2, ReLU   (H2 zero-padded 64 -> 128)
    h2 = jnp.dot(h1.astype(w2_ref.dtype), w2_ref[...],
                 preferred_element_type=jnp.float32)
    h2 = jnp.maximum(h2 + b2_ref[...], 0.0)
    # Layer 3: (TB, 128) @ (128, NC_pad) + b3   (lane-dense padded output)
    out = jnp.dot(h2.astype(w3_ref.dtype), w3_ref[...],
                  preferred_element_type=jnp.float32)
    o_ref[...] = (out + b3_ref[...]).astype(o_ref.dtype)


def _mlp_kernel_ktiled(x_ref, w1_ref, b1_ref, w2_ref, b2_ref, w3_ref, b3_ref,
                       o_ref, acc_ref):
    # Fallback for large in_features: layer 1 is K-tiled over the grid's last
    # axis with an f32 accumulator; layers 2-3 run on the final K step.
    k = pl.program_id(1)

    @pl.when(k == 0)
    def _():
        acc_ref[...] = jnp.zeros_like(acc_ref)

    acc_ref[...] += jnp.dot(x_ref[...].astype(jnp.bfloat16), w1_ref[...],
                            preferred_element_type=jnp.float32)

    @pl.when(k == pl.num_programs(1) - 1)
    def _():
        h1 = jnp.maximum(acc_ref[...] + b1_ref[...], 0.0)
        h2 = jnp.dot(h1.astype(w2_ref.dtype), w2_ref[...],
                     preferred_element_type=jnp.float32)
        h2 = jnp.maximum(h2 + b2_ref[...], 0.0)
        out = jnp.dot(h2.astype(w3_ref.dtype), w3_ref[...],
                      preferred_element_type=jnp.float32)
        o_ref[...] = (out + b3_ref[...]).astype(o_ref.dtype)


# --------------------------- helpers / specs --------------------------------


def _round_up(x, m):
    return ((x + m - 1) // m) * m


def _ceil_div(a, b):
    return -(-a // b)


def _vmem_capacity_bytes():
    try:
        return int(pltpu.get_tpu_info().vmem_capacity_bytes)
    except Exception:
        return 64 << 20  # conservative (v7x-sized) fallback


def _choose_batch_tiling(B):
    """Pick (TB, n_tiles): TB multiple of 8, tiles <= 256 rows, >= 2 tiles when
    possible (feed both TensorCores on v7x), padding waste kept small."""
    b8 = _round_up(B, 8)
    if b8 <= 8:
        return b8, 1
    n = max(2, _ceil_div(b8, 256))
    tb = _round_up(_ceil_div(b8, n), 8)
    n = _ceil_div(b8, tb)
    return tb, n


def _resident_spec(shape, single_buffer):
    """BlockSpec for a grid-invariant (VMEM-resident) operand."""
    index_map = lambda *_: (0,) * len(shape)
    if single_buffer:
        try:
            return pl.BlockSpec(shape, index_map, pipeline_mode=pl.Buffered(1))
        except TypeError:
            pass  # this jax build's BlockSpec has no pipeline_mode kwarg
    return pl.BlockSpec(shape, index_map)


# ------------------------ one-time parameter prep ---------------------------


def prepare_params(params, no_classes, *, vmem_capacity_bytes=None):
    """One-time TPU prep (hoisted out of the forward path): pad to lane-dense
    shapes and cast weights to bf16. Biases stay f32 (added post-accumulate)."""
    F, H1 = params["w1"].shape            # (in_features, 256)
    H2 = params["w2"].shape[1]            # 64
    NC = int(no_classes)
    NC_pad = _round_up(NC, 128)
    H2_pad = _round_up(H2, 128)

    cap = vmem_capacity_bytes or _vmem_capacity_bytes()
    # Resident strategy needs: single-buffered bf16 w1 + two 256-row f32 x tiles.
    F_pad128 = _round_up(F, 128)
    resident_ok = (F_pad128 * H1 * 2 + 2 * 256 * F_pad128 * 4) <= int(0.4 * cap)
    if resident_ok:
        use_ktile, tk, F_pad = False, 0, F_pad128
    else:
        tk = 1024
        use_ktile, F_pad = True, _round_up(F, tk)

    f32, bf16 = jnp.float32, jnp.bfloat16
    prepared = dict(
        w1=jnp.pad(params["w1"].astype(bf16), ((0, F_pad - F), (0, 0))),
        b1=params["b1"].astype(f32).reshape(1, H1),
        w2=jnp.pad(params["w2"].astype(bf16), ((0, 0), (0, H2_pad - H2))),
        b2=jnp.pad(params["b2"].astype(f32).reshape(1, H2),
                   ((0, 0), (0, H2_pad - H2))),
        w3=jnp.pad(params["w3"].astype(bf16),
                   ((0, H2_pad - H2), (0, NC_pad - NC))),
        b3=jnp.pad(params["b3"].astype(f32).reshape(1, NC),
                   ((0, 0), (0, NC_pad - NC))),
    )
    prepared = jax.tree_util.tree_map(jax.block_until_ready, prepared)
    meta = dict(NC=NC, use_ktile=use_ktile, tk=tk)
    return prepared, meta


# ------------------------------- forward ------------------------------------


@functools.partial(
    jax.jit,
    static_argnames=("tb", "n_tiles", "nc", "vmem_limit", "single_buffer"))
def _forward_resident(img, w1, b1, w2, b2, w3, b3, *, tb, n_tiles, nc,
                      vmem_limit, single_buffer):
    B = img.shape[0]
    x2d = img.reshape(B, -1).astype(jnp.float32)   # nn.Flatten (row-major C,H,W)
    F = x2d.shape[1]
    F_pad, H1 = w1.shape
    H2_pad = w2.shape[1]
    NC_pad = w3.shape[1]
    B_pad = tb * n_tiles

    x = jnp.pad(x2d, ((0, B_pad - B), (0, F_pad - F)))   # stays f32; cast in-kernel

    out = pl.pallas_call(
        _mlp_kernel,
        out_shape=jax.ShapeDtypeStruct((B_pad, NC_pad), jnp.float32),
        grid=(n_tiles,),
        in_specs=[
            pl.BlockSpec((tb, F_pad), lambda i: (i, 0)),       # x: streamed
            _resident_spec((F_pad, H1), single_buffer),        # w1: resident
            _resident_spec((1, H1), single_buffer),            # b1
            _resident_spec((H1, H2_pad), single_buffer),       # w2
            _resident_spec((1, H2_pad), single_buffer),        # b2
            _resident_spec((H2_pad, NC_pad), single_buffer),   # w3
            _resident_spec((1, NC_pad), single_buffer),        # b3
        ],
        out_specs=pl.BlockSpec((tb, NC_pad), lambda i: (i, 0)),
        compiler_params=pltpu.CompilerParams(
            dimension_semantics=("parallel",),
            vmem_limit_bytes=vmem_limit,
        ),
    )(x, w1, b1, w2, b2, w3, b3)
    return out[:B, :nc]


@functools.partial(
    jax.jit,
    static_argnames=("tb", "n_tiles", "nc", "tk", "vmem_limit", "single_buffer"))
def _forward_ktiled(img, w1, b1, w2, b2, w3, b3, *, tb, n_tiles, nc, tk,
                    vmem_limit, single_buffer):
    B = img.shape[0]
    x2d = img.reshape(B, -1).astype(jnp.float32)
    F = x2d.shape[1]
    F_pad, H1 = w1.shape
    H2_pad = w2.shape[1]
    NC_pad = w3.shape[1]
    B_pad = tb * n_tiles
    n_k = F_pad // tk

    x = jnp.pad(x2d, ((0, B_pad - B), (0, F_pad - F)))

    out = pl.pallas_call(
        _mlp_kernel_ktiled,
        out_shape=jax.ShapeDtypeStruct((B_pad, NC_pad), jnp.float32),
        grid=(n_tiles, n_k),
        in_specs=[
            pl.BlockSpec((tb, tk), lambda i, k: (i, k)),       # x: streamed (B, K)
            pl.BlockSpec((tk, H1), lambda i, k: (k, 0)),       # w1: streamed over K
            _resident_spec((1, H1), single_buffer),
            _resident_spec((H1, H2_pad), single_buffer),
            _resident_spec((1, H2_pad), single_buffer),
            _resident_spec((H2_pad, NC_pad), single_buffer),
            _resident_spec((1, NC_pad), single_buffer),
        ],
        out_specs=pl.BlockSpec((tb, NC_pad), lambda i, k: (i, 0)),
        scratch_shapes=[pltpu.VMEM((tb, H1), jnp.float32)],
        compiler_params=pltpu.CompilerParams(
            dimension_semantics=("parallel", "arbitrary"),
            vmem_limit_bytes=vmem_limit,
        ),
    )(x, w1, b1, w2, b2, w3, b3)
    return out[:B, :nc]


def big_classifier_forward(img, prepared, meta):
    """Forward pass. `prepared`/`meta` come from prepare_params (called once)."""
    B = int(img.shape[0])
    tb, n_tiles = _choose_batch_tiling(B)
    cap = _vmem_capacity_bytes()

    w_bytes = sum(int(prepared[k].size) * prepared[k].dtype.itemsize
                  for k in ("w1", "w2", "w3"))
    b_bytes = sum(int(prepared[k].size) * prepared[k].dtype.itemsize
                  for k in ("b1", "b2", "b3"))
    F_pad, H1 = prepared["w1"].shape
    NC_pad = prepared["w3"].shape[1]

    if meta["use_ktile"]:
        tk = meta["tk"]
        streamed = 2 * tb * (tk + NC_pad) * 4 + 2 * tk * H1 * 2 + tb * H1 * 4
        w1_bytes = int(prepared["w1"].size) * prepared["w1"].dtype.itemsize
        need = (w_bytes - w1_bytes) + b_bytes + streamed
        fwd = functools.partial(_forward_ktiled, tk=tk)
    else:
        streamed = 2 * tb * (F_pad + NC_pad) * 4
        need = w_bytes + b_bytes + streamed
        fwd = _forward_resident

    # Generation-aware clamp: 0.75 * physical VMEM (64 MiB v7x / 128 MiB v5e,v6e).
    vmem_limit = int(min(max(2 * need, 16 << 20), int(0.75 * cap)))

    args = (img, prepared["w1"], prepared["b1"], prepared["w2"], prepared["b2"],
            prepared["w3"], prepared["b3"])
    kwargs = dict(tb=tb, n_tiles=n_tiles, nc=meta["NC"], vmem_limit=vmem_limit)
    try:
        return fwd(*args, single_buffer=True, **kwargs)
    except Exception:
        # Fallback if this jax build rejects pipeline_mode=pl.Buffered(1).
        return fwd(*args, single_buffer=False, **kwargs)


# ----------------------------- init / reference -----------------------------


def init_params(key, in_features, no_classes):
    """Deterministic init mimicking PyTorch nn.Linear (uniform +/- 1/sqrt(fan_in)).
    Weights stored as (in, out) — already transposed vs torch's (out, in)."""
    dims = [(in_features, 256), (256, 64), (64, no_classes)]
    params = {}
    for idx, (fan_in, fan_out) in enumerate(dims, start=1):
        key, kw, kb = jax.random.split(key, 3)
        bound = 1.0 / (fan_in ** 0.5)
        params[f"w{idx}"] = jax.random.uniform(
            kw, (fan_in, fan_out), jnp.float32, -bound, bound)
        params[f"b{idx}"] = jax.random.uniform(
            kb, (1, fan_out), jnp.float32, -bound, bound)
    return params


def reference_forward(img, params):
    """Pure-JAX reference with the same bf16-weight / f32-accumulate numerics."""
    x = img.reshape(img.shape[0], -1)

    def dot(a, w):
        return jnp.dot(a.astype(jnp.bfloat16), w.astype(jnp.bfloat16),
                       preferred_element_type=jnp.float32)

    h = jnp.maximum(dot(x, params["w1"]) + params["b1"], 0.0)
    h = jnp.maximum(dot(h, params["w2"]) + params["b2"], 0.0)
    return dot(h, params["w3"]) + params["b3"]


if __name__ == "__main__":
    # Small shapes consistent with the module: NCHW image, flattened in_features.
    B, C, H, W = 2, 4, 16, 16
    in_features = C * H * W          # 1024
    no_classes = 10

    key = jax.random.PRNGKey(0)
    key, kimg = jax.random.split(key)
    img = jax.random.normal(kimg, (B, C, H, W), jnp.float32)
    params = init_params(key, in_features, no_classes)

    # One-time weight prep (pad + bf16 cast) — hoisted out of the forward path.
    prepared, meta = prepare_params(params, no_classes)

    out = big_classifier_forward(img, prepared, meta)
    out = jax.block_until_ready(out)

    ref = reference_forward(img, params)
    assert out.shape == (B, no_classes)
    max_err = float(jnp.max(jnp.abs(out - ref)))
    assert jnp.allclose(out, ref, atol=5e-3, rtol=5e-3), max_err

    print("KERNEL_OK")
</pallas_src>

<mosaic_0001>
module attributes {stable_mosaic.version = 11 : i64} {
  func.func @_mlp_kernel(%arg0: i32, %arg1: memref<8x1024xf32, #tpu.memory_space<vmem>>, %arg2: memref<1024x256xbf16, #tpu.memory_space<vmem>>, %arg3: memref<1x256xf32, #tpu.memory_space<vmem>>, %arg4: memref<256x128xbf16, #tpu.memory_space<vmem>>, %arg5: memref<1x128xf32, #tpu.memory_space<vmem>>, %arg6: memref<128x128xbf16, #tpu.memory_space<vmem>>, %arg7: memref<1x128xf32, #tpu.memory_space<vmem>>, %arg8: memref<8x128xf32, #tpu.memory_space<vmem>>) attributes {dimension_semantics = [#tpu.dimension_semantics<parallel>], iteration_bounds = array<i64: 1>, scalar_prefetch = 0 : i64, scratch_operands = 0 : i64, tpu.core_type = #tpu.core_type<tc>, window_params = [{transform_indices = @transform_0, window_bounds = array<i64: 8, 1024>}, {pipeline_mode = #tpu.pipeline_mode<synchronous>, transform_indices = @transform_1, window_bounds = array<i64: 1024, 256>}, {pipeline_mode = #tpu.pipeline_mode<synchronous>, transform_indices = @transform_2, window_bounds = array<i64: 1, 256>}, {pipeline_mode = #tpu.pipeline_mode<synchronous>, transform_indices = @transform_3, window_bounds = array<i64: 256, 128>}, {pipeline_mode = #tpu.pipeline_mode<synchronous>, transform_indices = @transform_4, window_bounds = array<i64: 1, 128>}, {pipeline_mode = #tpu.pipeline_mode<synchronous>, transform_indices = @transform_5, window_bounds = array<i64: 128, 128>}, {pipeline_mode = #tpu.pipeline_mode<synchronous>, transform_indices = @transform_6, window_bounds = array<i64: 1, 128>}, {transform_indices = @transform_7, window_bounds = array<i64: 8, 128>}]} {
    %c0 = arith.constant 0 : index
    %c0_0 = arith.constant 0 : index
    %0 = vector.load %arg1[%c0, %c0_0] : memref<8x1024xf32, #tpu.memory_space<vmem>>, vector<8x1024xf32>
    %1 = arith.truncf %0 : vector<8x1024xf32> to vector<8x1024xbf16>
    %c0_1 = arith.constant 0 : index
    %c0_2 = arith.constant 0 : index
    %2 = vector.load %arg2[%c0_1, %c0_2] : memref<1024x256xbf16, #tpu.memory_space<vmem>>, vector<1024x256xbf16>
    %cst = arith.constant dense<0.000000e+00> : vector<8x256xf32>
    %3 = tpu.matmul %1, %2, %cst {dimension_numbers = #tpu.dot_dimension_numbers<[1], [0], [0], [1], [0, 0, 1, 1], [], []>} : vector<8x1024xbf16>, vector<1024x256xbf16>, vector<8x256xf32> -> vector<8x256xf32>
    %c0_3 = arith.constant 0 : index
    %c0_4 = arith.constant 0 : index
    %4 = vector.load %arg3[%c0_3, %c0_4] : memref<1x256xf32, #tpu.memory_space<vmem>>, vector<1x256xf32>
    %5 = vector.broadcast %4 : vector<1x256xf32> to vector<8x256xf32>
    %6 = arith.addf %3, %5 : vector<8x256xf32>
    %cst_5 = arith.constant 0.000000e+00 : f32
    %7 = vector.broadcast %cst_5 : f32 to vector<8x256xf32>
    %8 = arith.maximumf %6, %7 : vector<8x256xf32>
    %9 = arith.truncf %8 : vector<8x256xf32> to vector<8x256xbf16>
    %c0_6 = arith.constant 0 : index
    %c0_7 = arith.constant 0 : index
    %10 = vector.load %arg4[%c0_6, %c0_7] : memref<256x128xbf16, #tpu.memory_space<vmem>>, vector<256x128xbf16>
    %cst_8 = arith.constant dense<0.000000e+00> : vector<8x128xf32>
    %11 = tpu.matmul %9, %10, %cst_8 {dimension_numbers = #tpu.dot_dimension_numbers<[1], [0], [0], [1], [0, 0, 1, 1], [], []>} : vector<8x256xbf16>, vector<256x128xbf16>, vector<8x128xf32> -> vector<8x128xf32>
    %c0_9 = arith.constant 0 : index
    %c0_10 = arith.constant 0 : index
    %12 = vector.load %arg5[%c0_9, %c0_10] : memref<1x128xf32, #tpu.memory_space<vmem>>, vector<1x128xf32>
    %13 = vector.broadcast %12 : vector<1x128xf32> to vector<8x128xf32>
    %14 = arith.addf %11, %13 : vector<8x128xf32>
    %cst_11 = arith.constant 0.000000e+00 : f32
    %15 = vector.broadcast %cst_11 : f32 to vector<8x128xf32>
    %16 = arith.maximumf %14, %15 : vector<8x128xf32>
    %17 = arith.truncf %16 : vector<8x128xf32> to vector<8x128xbf16>
    %c0_12 = arith.constant 0 : index
    %c0_13 = arith.constant 0 : index
    %18 = vector.load %arg6[%c0_12, %c0_13] : memref<128x128xbf16, #tpu.memory_space<vmem>>, vector<128x128xbf16>
    %cst_14 = arith.constant dense<0.000000e+00> : vector<8x128xf32>
    %19 = tpu.matmul %17, %18, %cst_14 {dimension_numbers = #tpu.dot_dimension_numbers<[1], [0], [0], [1], [0, 0, 1, 1], [], []>} : vector<8x128xbf16>, vector<128x128xbf16>, vector<8x128xf32> -> vector<8x128xf32>
    %c0_15 = arith.constant 0 : index
    %c0_16 = arith.constant 0 : index
    %20 = vector.load %arg7[%c0_15, %c0_16] : memref<1x128xf32, #tpu.memory_space<vmem>>, vector<1x128xf32>
    %21 = vector.broadcast %20 : vector<1x128xf32> to vector<8x128xf32>
    %22 = arith.addf %19, %21 : vector<8x128xf32>
    %c0_17 = arith.constant 0 : index
    %c0_18 = arith.constant 0 : index
    %23 = vector.load %arg8[%c0_17, %c0_18] : memref<8x128xf32, #tpu.memory_space<vmem>>, vector<8x128xf32>
    tpu.vector_store %arg8[%c0_17, %c0_18], %22 {strides = array<i32>} : memref<8x128xf32, #tpu.memory_space<vmem>>, vector<8x128xf32>,
    return
  }
  func.func @transform_0(%arg0: i32) -> (i32, i32) {
    %c0_i32 = arith.constant 0 : i32
    %c0_i32_0 = arith.constant 0 : i32
    return %arg0, %c0_i32 : i32, i32
  }
  func.func @transform_1(%arg0: i32) -> (i32, i32) {
    %c0_i32 = arith.constant 0 : i32
    %c0_i32_0 = arith.constant 0 : i32
    %c0_i32_1 = arith.constant 0 : i32
    return %c0_i32, %c0_i32_0 : i32, i32
  }
  func.func @transform_2(%arg0: i32) -> (i32, i32) {
    %c0_i32 = arith.constant 0 : i32
    %c0_i32_0 = arith.constant 0 : i32
    %c0_i32_1 = arith.constant 0 : i32
    return %c0_i32, %c0_i32_0 : i32, i32
  }
  func.func @transform_3(%arg0: i32) -> (i32, i32) {
    %c0_i32 = arith.constant 0 : i32
    %c0_i32_0 = arith.constant 0 : i32
    %c0_i32_1 = arith.constant 0 : i32
    return %c0_i32, %c0_i32_0 : i32, i32
  }
  func.func @transform_4(%arg0: i32) -> (i32, i32) {
    %c0_i32 = arith.constant 0 : i32
    %c0_i32_0 = arith.constant 0 : i32
    %c0_i32_1 = arith.constant 0 : i32
    return %c0_i32, %c0_i32_0 : i32, i32
  }
  func.func @transform_5(%arg0: i32) -> (i32, i32) {
    %c0_i32 = arith.constant 0 : i32
    %c0_i32_0 = arith.constant 0 : i32
    %c0_i32_1 = arith.constant 0 : i32
    return %c0_i32, %c0_i32_0 : i32, i32
  }
  func.func @transform_6(%arg0: i32) -> (i32, i32) {
    %c0_i32 = arith.constant 0 : i32
    %c0_i32_0 = arith.constant 0 : i32
    %c0_i32_1 = arith.constant 0 : i32
    return %c0_i32, %c0_i32_0 : i32, i32
  }
  func.func @transform_7(%arg0: i32) -> (i32, i32) {
    %c0_i32 = arith.constant 0 : i32
    %c0_i32_0 = arith.constant 0 : i32
    return %arg0, %c0_i32 : i32, i32
  }
}

module attributes {stable_mosaic.version = 11 : i64} {
  func.func @_mlp_kernel(%arg0: i32, %arg1: memref<8x1024xf32, #tpu.memory_space<vmem>>, %arg2: memref<1024x256xbf16, #tpu.memory_space<vmem>>, %arg3: memref<1x256xf32, #tpu.memory_space<vmem>>, %arg4: memref<256x128xbf16, #tpu.memory_space<vmem>>, %arg5: memref<1x128xf32, #tpu.memory_space<vmem>>, %arg6: memref<128x128xbf16, #tpu.memory_space<vmem>>, %arg7: memref<1x128xf32, #tpu.memory_space<vmem>>, %arg8: memref<8x128xf32, #tpu.memory_space<vmem>>) attributes {dimension_semantics = [#tpu.dimension_semantics<parallel>], iteration_bounds = array<i64: 1>, scalar_prefetch = 0 : i64, scratch_operands = 0 : i64, tpu.core_type = #tpu.core_type<tc>, window_params = [{transform_indices = @transform_0, window_bounds = array<i64: 8, 1024>}, {pipeline_mode = #tpu.pipeline_mode<synchronous>, transform_indices = @transform_1, window_bounds = array<i64: 1024, 256>}, {pipeline_mode = #tpu.pipeline_mode<synchronous>, transform_indices = @transform_2, window_bounds = array<i64: 1, 256>}, {pipeline_mode = #tpu.pipeline_mode<synchronous>, transform_indices = @transform_3, window_bounds = array<i64: 256, 128>}, {pipeline_mode = #tpu.pipeline_mode<synchronous>, transform_indices = @transform_4, window_bounds = array<i64: 1, 128>}, {pipeline_mode = #tpu.pipeline_mode<synchronous>, transform_indices = @transform_5, window_bounds = array<i64: 128, 128>}, {pipeline_mode = #tpu.pipeline_mode<synchronous>, transform_indices = @transform_6, window_bounds = array<i64: 1, 128>}, {transform_indices = @transform_7, window_bounds = array<i64: 8, 128>}]} {
    %c0 = arith.constant 0 : index
    %c0_0 = arith.constant 0 : index
    %0 = vector.load %arg1[%c0, %c0_0] : memref<8x1024xf32, #tpu.memory_space<vmem>>, vector<8x1024xf32>
    %1 = arith.truncf %0 : vector<8x1024xf32> to vector<8x1024xbf16>
    %c0_1 = arith.constant 0 : index
    %c0_2 = arith.constant 0 : index
    %2 = vector.load %arg2[%c0_1, %c0_2] : memref<1024x256xbf16, #tpu.memory_space<vmem>>, vector<1024x256xbf16>
    %cst = arith.constant dense<0.000000e+00> : vector<8x256xf32>
    %3 = tpu.matmul %1, %2, %cst {dimension_numbers = #tpu.dot_dimension_numbers<[1], [0], [0], [1], [0, 0, 1, 1], [], []>} : vector<8x1024xbf16>, vector<1024x256xbf16>, vector<8x256xf32> -> vector<8x256xf32>
    %c0_3 = arith.constant 0 : index
    %c0_4 = arith.constant 0 : index
    %4 = vector.load %arg3[%c0_3, %c0_4] : memref<1x256xf32, #tpu.memory_space<vmem>>, vector<1x256xf32>
    %5 = vector.broadcast %4 : vector<1x256xf32> to vector<8x256xf32>
    %6 = arith.addf %3, %5 : vector<8x256xf32>
    %cst_5 = arith.constant 0.000000e+00 : f32
    %7 = vector.broadcast %cst_5 : f32 to vector<8x256xf32>
    %8 = arith.maximumf %6, %7 : vector<8x256xf32>
    %9 = arith.truncf %8 : vector<8x256xf32> to vector<8x256xbf16>
    %c0_6 = arith.constant 0 : index
    %c0_7 = arith.constant 0 : index
    %10 = vector.load %arg4[%c0_6, %c0_7] : memref<256x128xbf16, #tpu.memory_space<vmem>>, vector<256x128xbf16>
    %cst_8 = arith.constant dense<0.000000e+00> : vector<8x128xf32>
    %11 = tpu.matmul %9, %10, %cst_8 {dimension_numbers = #tpu.dot_dimension_numbers<[1], [0], [0], [1], [0, 0, 1, 1], [], []>} : vector<8x256xbf16>, vector<256x128xbf16>, vector<8x128xf32> -> vector<8x128xf32>
    %c0_9 = arith.constant 0 : index
    %c0_10 = arith.constant 0 : index
    %12 = vector.load %arg5[%c0_9, %c0_10] : memref<1x128xf32, #tpu.memory_space<vmem>>, vector<1x128xf32>
    %13 = vector.broadcast %12 : vector<1x128xf32> to vector<8x128xf32>
    %14 = arith.addf %11, %13 : vector<8x128xf32>
    %cst_11 = arith.constant 0.000000e+00 : f32
    %15 = vector.broadcast %cst_11 : f32 to vector<8x128xf32>
    %16 = arith.maximumf %14, %15 : vector<8x128xf32>
    %17 = arith.truncf %16 : vector<8x128xf32> to vector<8x128xbf16>
    %c0_12 = arith.constant 0 : index
    %c0_13 = arith.constant 0 : index
    %18 = vector.load %arg6[%c0_12, %c0_13] : memref<128x128xbf16, #tpu.memory_space<vmem>>, vector<128x128xbf16>
    %cst_14 = arith.constant dense<0.000000e+00> : vector<8x128xf32>
    %19 = tpu.matmul %17, %18, %cst_14 {dimension_numbers = #tpu.dot_dimension_numbers<[1], [0], [0], [1], [0, 0, 1, 1], [], []>} : vector<8x128xbf16>, vector<128x128xbf16>, vector<8x128xf32> -> vector<8x128xf32>
    %c0_15 = arith.constant 0 : index
    %c0_16 = arith.constant 0 : index
    %20 = vector.load %arg7[%c0_15, %c0_16] : memref<1x128xf32, #tpu.memory_space<vmem>>, vector<1x128xf32>
    %21 = vector.broadcast %20 : vector<1x128xf32> to vector<8x128xf32>
    %22 = arith.addf %19, %21 : vector<8x128xf32>
    %c0_17 = arith.constant 0 : index
    %c0_18 = arith.constant 0 : index
    %23 = vector.load %arg8[%c0_17, %c0_18] : memref<8x128xf32, #tpu.memory_space<vmem>>, vector<8x128xf32>
    tpu.vector_store %arg8[%c0_17, %c0_18], %22 {strides = array<i32>} : memref<8x128xf32, #tpu.memory_space<vmem>>, vector<8x128xf32>,
    return
  }
  func.func @transform_0(%arg0: i32) -> (i32, i32) {
    %c0_i32 = arith.constant 0 : i32
    %c0_i32_0 = arith.constant 0 : i32
    return %arg0, %c0_i32 : i32, i32
  }
  func.func @transform_1(%arg0: i32) -> (i32, i32) {
    %c0_i32 = arith.constant 0 : i32
    %c0_i32_0 = arith.constant 0 : i32
    %c0_i32_1 = arith.constant 0 : i32
    return %c0_i32, %c0_i32_0 : i32, i32
  }
  func.func @transform_2(%arg0: i32) -> (i32, i32) {
    %c0_i32 = arith.constant 0 : i32
    %c0_i32_0 = arith.constant 0 : i32
    %c0_i32_1 = arith.constant 0 : i32
    return %c0_i32, %c0_i32_0 : i32, i32
  }
  func.func @transform_3(%arg0: i32) -> (i32, i32) {
    %c0_i32 = arith.constant 0 : i32
    %c0_i32_0 = arith.constant 0 : i32
    %c0_i32_1 = arith.constant 0 : i32
    return %c0_i32, %c0_i32_0 : i32, i32
  }
  func.func @transform_4(%arg0: i32) -> (i32, i32) {
    %c0_i32 = arith.constant 0 : i32
    %c0_i32_0 = arith.constant 0 : i32
    %c0_i32_1 = arith.constant 0 : i32
    return %c0_i32, %c0_i32_0 : i32, i32
  }
  func.func @transform_5(%arg0: i32) -> (i32, i32) {
    %c0_i32 = arith.constant 0 : i32
    %c0_i32_0 = arith.constant 0 : i32
    %c0_i32_1 = arith.constant 0 : i32
    return %c0_i32, %c0_i32_0 : i32, i32
  }
  func.func @transform_6(%arg0: i32) -> (i32, i32) {
    %c0_i32 = arith.constant 0 : i32
    %c0_i32_0 = arith.constant 0 : i32
    %c0_i32_1 = arith.constant 0 : i32
    return %c0_i32, %c0_i32_0 : i32, i32
  }
  func.func @transform_7(%arg0: i32) -> (i32, i32) {
    %c0_i32 = arith.constant 0 : i32
    %c0_i32_0 = arith.constant 0 : i32
    return %arg0, %c0_i32 : i32, i32
  }
}

</mosaic_0001>

<bundles_post_ra>
// kernel: _forward_resident.1
= control target key start
LH: loop header
LB: loop body
LE: loop exit
PB: predicated region body
PF: predicated region fallthrough
CT: control target
= control target key end

     0   :  { %12 = vsyncpa [#allocation3], 0  ;;  %s1747_s24 = smov [#allocation2]   ;;  %s1903_s0 = inlined_call_operand.vmem [shape: f32[8,1024], index: 0, kind: input, shape index: {}]   ;;  %s1904_s1 = inlined_call_operand.hbm [shape: bf16[1024,256], index: 1, kind: input, shape index: {}]   ;;  %s1905_s2 = inlined_call_operand.vmem [shape: f32[1,256], index: 2, kind: input, shape index: {}]   ;;  %s1906_s3 = inlined_call_operand.vmem [shape: bf16[256,128], index: 3, kind: input, shape index: {}]   ;;  %s1907_s4 = inlined_call_operand.vmem [shape: f32[1,128], index: 4, kind: input, shape index: {}]   ;;  %s1908_s5 = inlined_call_operand.vmem [shape: bf16[128,128], index: 5, kind: input, shape index: {}]   ;;  %s1909_s6 = inlined_call_operand.vmem [shape: f32[1,128], index: 6, kind: input, shape index: {}]   ;;  %s1910_s7 = inlined_call_operand.vmem [shape: f32[8,128], index: 7, kind: output, shape index: {}]  }
   0x1   :  { %s20_s25 = sshll.u32 %s1747_s24, 4  ;;  %s21_s25 = int_to_ptr.vmem [resolvable:$true] %s20_s25 }
   0x2   :  { %s1733_s26 = scalar_lea.vmem %s21_s25, 16384  ;;  %p1738_p1 = scmp.lt.s32.totalorder %s21_s25, %s21_s25 }
   0x3   :  { %p1734_p0 = scmp.ne.s32.totalorder %s21_s25, %s1733_s26  ;;  %p1739_p2 = scmp.lt.s32.totalorder %s1733_s26, %s1733_s26 }
   0x5   :  { %p1740_p3 = por %p1739_p2, %p1738_p1 }
   0x7   :  { %p1741_p4 = pnand %p1740_p3, %p1734_p0 }
   0x9   :  { %1744 = shalt.err (!%p1741_p4)
}
   0xa   :  { %s1748_s27 = smov 128   ;;  %s1749_s28 = smov 8  }
   0xb   :  { %26 = dma.hbm_to_vmem [thread:$0]  %s1904_s1, 16384, %s21_s25, [#allocation3], %s1748_s27, %s1748_s27, %s1749_s28  }
   0xc   :  { %1745 = dma.done.wait [#allocation3], 16384  }
   0xd   :  { %1746 = vsyncadd [#allocation3], 4294950912  ;;  %v1509_v0 = vld [vmem:[#allocation2 + $0x74] ss:$8 sps:$4 sm:$0xff]   ;;  %v1513_v2 = vld [vmem:[#allocation2 + $0x70] ss:$8 sps:$4 sm:$0xff]  }
   0xe   :  { %v1511_v1 = vld [vmem:[#allocation2 + $0x174] ss:$8 sps:$4 sm:$0xff]   ;;  %837 = vmatprep.subr.bf16.mxu0 %v1509_v0  ;;  %v1514_v3 = vld [vmem:[#allocation2 + $0x170] ss:$8 sps:$4 sm:$0xff]   ;;  %v1515_v4 = vld [vmem:[#allocation2 + $0x64] ss:$8 sps:$4 sm:$0xff]  }
   0xf   :  { %878 = vmatprep.subr.bf16.mxu1 %v1511_v1  ;;  %838 = vmatpush1.bf16.msra.mxu0 %v1513_v2  ;;  %v1517_v5 = vld [vmem:[#allocation2 + $0x164] ss:$8 sps:$4 sm:$0xff]   ;;  %v1519_v6 = vld [vmem:[#allocation2 + $0x60] ss:$8 sps:$4 sm:$0xff]   ;;  %v1521_v8 = vld [vmem:[#allocation2 + $0x54] ss:$8 sps:$4 sm:$0xff]  }
  0x10   :  { %879 = vmatpush1.bf16.msra.mxu1 %v1514_v3  ;;  %839 = vmatprep.subr.bf16.mxu0 %v1515_v4  ;;  %v1520_v7 = vld [vmem:[#allocation2 + $0x160] ss:$8 sps:$4 sm:$0xff]   ;;  %v1523_v9 = vld [vmem:[#allocation2 + $0x154] ss:$8 sps:$4 sm:$0xff]   ;;  %v1525_v10 = vld [vmem:[#allocation2 + $0x50] ss:$8 sps:$4 sm:$0xff]  }
  0x11   :  { %880 = vmatprep.subr.bf16.mxu1 %v1517_v5  ;;  %v1526_v11 = vld [vmem:[#allocation2 + $0x150] ss:$8 sps:$4 sm:$0xff]   ;;  %v1527_v12 = vld [vmem:[#allocation2 + $0x44] ss:$8 sps:$4 sm:$0xff]   ;;  %v1531_v14 = vld [vmem:[#allocation2 + $0x40] ss:$8 sps:$4 sm:$0xff]  }
  0x12   :  { %v1529_v13 = vld [vmem:[#allocation2 + $0x144] ss:$8 sps:$4 sm:$0xff]   ;;  %v1532_v15 = vld [vmem:[#allocation2 + $0x140] ss:$8 sps:$4 sm:$0xff]   ;;  %v1533_v16 = vld [vmem:[#allocation2 + $0x34] ss:$8 sps:$4 sm:$0xff]  }
  0x13   :  { %840 = vmatpush1.bf16.msra.mxu0 %v1519_v6  ;;  %v1535_v17 = vld [vmem:[#allocation2 + $0x134] ss:$8 sps:$4 sm:$0xff]   ;;  %v1537_v18 = vld [vmem:[#allocation2 + $0x30] ss:$8 sps:$4 sm:$0xff]   ;;  %v1539_v20 = vld [vmem:[#allocation2 + $0x24] ss:$8 sps:$4 sm:$0xff]  }
  0x14   :  { %881 = vmatpush1.bf16.msra.mxu1 %v1520_v7  ;;  %841 = vmatprep.subr.bf16.mxu0 %v1521_v8  ;;  %v1538_v19 = vld [vmem:[#allocation2 + $0x130] ss:$8 sps:$4 sm:$0xff]   ;;  %v1541_v21 = vld [vmem:[#allocation2 + $0x124] ss:$8 sps:$4 sm:$0xff]   ;;  %v1543_v22 = vld [vmem:[#allocation2 + $0x20] ss:$8 sps:$4 sm:$0xff]  }
  0x15   :  { %882 = vmatprep.subr.bf16.mxu1 %v1523_v9  ;;  %v1544_v23 = vld [vmem:[#allocation2 + $0x120] ss:$8 sps:$4 sm:$0xff]   ;;  %v1545_v24 = vld [vmem:[#allocation2 + $0x14] ss:$8 sps:$4 sm:$0xff]   ;;  %v1549_v26 = vld [vmem:[#allocation2 + $0x10] ss:$8 sps:$4 sm:$0xff]  }
  0x16   :  { %v1547_v25 = vld [vmem:[#allocation2 + $0x114] ss:$8 sps:$4 sm:$0xff]   ;;  %v1550_v27 = vld [vmem:[#allocation2 + $0x110] ss:$8 sps:$4 sm:$0xff]   ;;  %v1551_v28 = vld [vmem:[#allocation2 + $0x4] ss:$8 sps:$4 sm:$0xff]  }
  0x17   :  { %842 = vmatpush1.bf16.msra.mxu0 %v1525_v10  ;;  %v1553_v29 = vld [vmem:[#allocation2 + $0x104] ss:$8 sps:$4 sm:$0xff]   ;;  %v1555_v30 = vld [vmem:[#allocation2] ss:$8 sps:$4 sm:$0xff]   ;;  %v1557_v32 = vld [vmem:[#allocation2 + $0xf4] ss:$8 sps:$4 sm:$0xff]  }
  0x18   :  { %883 = vmatpush1.bf16.msra.mxu1 %v1526_v11  ;;  %843 = vmatprep.subr.bf16.mxu0 %v1527_v12  ;;  %v1556_v31 = vld [vmem:[#allocation2 + $0x100] ss:$8 sps:$4 sm:$0xff]   ;;  %v1559_v33 = vld [vmem:[#allocation2 + $0x1f4] ss:$8 sps:$4 sm:$0xff]   ;;  %v1561_v34 = vld [vmem:[#allocation2 + $0xf0] ss:$8 sps:$4 sm:$0xff]  }
  0x19   :  { %884 = vmatprep.subr.bf16.mxu1 %v1529_v13  ;;  %v1562_v35 = vld [vmem:[#allocation2 + $0x1f0] ss:$8 sps:$4 sm:$0xff]   ;;  %v1563_v36 = vld [vmem:[#allocation2 + $0xe4] ss:$8 sps:$4 sm:$0xff]   ;;  %v1567_v38 = vld [vmem:[#allocation2 + $0xe0] ss:$8 sps:$4 sm:$0xff]  }
  0x1a   :  { %v1565_v37 = vld [vmem:[#allocation2 + $0x1e4] ss:$8 sps:$4 sm:$0xff]   ;;  %v1568_v39 = vld [vmem:[#allocation2 + $0x1e0] ss:$8 sps:$4 sm:$0xff]   ;;  %v1569_v40 = vld [vmem:[#allocation2 + $0xd4] ss:$8 sps:$4 sm:$0xff]  }
  0x1b   :  { %844 = vmatpush1.bf16.msra.mxu0 %v1531_v14  ;;  %v1571_v41 = vld [vmem:[#allocation2 + $0x1d4] ss:$8 sps:$4 sm:$0xff]   ;;  %v1573_v42 = vld [vmem:[#allocation2 + $0xd0] ss:$8 sps:$4 sm:$0xff]   ;;  %v1575_v44 = vld [vmem:[#allocation2 + $0xc4] ss:$8 sps:$4 sm:$0xff]  }
  0x1c   :  { %885 = vmatpush1.bf16.msra.mxu1 %v1532_v15  ;;  %845 = vmatprep.subr.bf16.mxu0 %v1533_v16  ;;  %v1574_v43 = vld [vmem:[#allocation2 + $0x1d0] ss:$8 sps:$4 sm:$0xff]   ;;  %v1577_v45 = vld [vmem:[#allocation2 + $0x1c4] ss:$8 sps:$4 sm:$0xff]   ;;  %v1579_v47 = vld [vmem:[#allocation2 + $0xc0] ss:$8 sps:$4 sm:$0xff]  }
  0x1d   :  { %886 = vmatprep.subr.bf16.mxu1 %v1535_v17  ;;  %v42_v46 = vld [vmem:[%s1903_s0 + $0x8] sm:$0xff]  ;;  %v44_v50 = vld [vmem:[%s1903_s0 + $0x18] sm:$0xff]  ;;  %v41_v4 = vld [vmem:[%s1903_s0] sm:$0xff]  ;;  %vm1751_vm0 = vmmov 0  }
  0x1e   :  { %v1580_v48 = vld [vmem:[#allocation2 + $0x1c0] ss:$8 sps:$4 sm:$0xff]   ;;  %v50_v49 = vpack.c.bf16 %v42_v46, %v42_v46  ;;  %v1581_v51 = vld [vmem:[#allocation2 + $0xb4] ss:$8 sps:$4 sm:$0xff]   ;;  %v52_v52 = vpack.c.bf16 %v44_v50, %v44_v50  ;;  %v1585_v54 = vld [vmem:[#allocation2 + $0xb0] ss:$8 sps:$4 sm:$0xff]   ;;  %v49_v8 = vpack.c.bf16 %v41_v4, %v41_v4 }
  0x1f   :  { %846 = vmatpush1.bf16.msra.mxu0 %v1537_v18  ;;  %v1583_v53 = vld [vmem:[#allocation2 + $0x1b4] ss:$8 sps:$4 sm:$0xff]   ;;  %v1586_v55 = vld [vmem:[#allocation2 + $0x1b0] ss:$8 sps:$4 sm:$0xff]   ;;  %v1587_v56 = vld [vmem:[#allocation2 + $0xa4] ss:$8 sps:$4 sm:$0xff]  }
  0x20   :  { %887 = vmatpush1.bf16.msra.mxu1 %v1538_v19  ;;  %847 = vmatprep.subr.bf16.mxu0 %v1539_v20  ;;  %v1589_v57 = vld [vmem:[#allocation2 + $0x1a4] ss:$8 sps:$4 sm:$0xff]   ;;  %v1591_v58 = vld [vmem:[#allocation2 + $0xa0] ss:$8 sps:$4 sm:$0xff]   ;;  %v1593_v60 = vld [vmem:[#allocation2 + $0x94] ss:$8 sps:$4 sm:$0xff]  }
  0x21   :  { %888 = vmatprep.subr.bf16.mxu1 %v1541_v21  ;;  %869 = vmatprep.mubr.bf16.mxu0 %v50_v49  ;;  %v1592_v59 = vld [vmem:[#allocation2 + $0x1a0] ss:$8 sps:$4 sm:$0xff]   ;;  %v1595_v61 = vld [vmem:[#allocation2 + $0x194] ss:$8 sps:$4 sm:$0xff]   ;;  %v1597_v62 = vld [vmem:[#allocation2 + $0x90] ss:$8 sps:$4 sm:$0xff]  }
  0x22   :  { %910 = vmatprep.mubr.bf16.mxu1 %v52_v52  ;;  %v1598_v63 = vld [vmem:[#allocation2 + $0x190] ss:$8 sps:$4 sm:$0xff]   ;;  %v1599_v0 = vld [vmem:[#allocation2 + $0x84] ss:$8 sps:$4 sm:$0xff]   ;;  %v1603_v2 = vld [vmem:[#allocation2 + $0x80] ss:$8 sps:$4 sm:$0xff]  }
  0x23   :  { %848 = vmatpush1.bf16.msra.mxu0 %v1543_v22  ;;  %v1601_v1 = vld [vmem:[#allocation2 + $0x184] ss:$8 sps:$4 sm:$0xff]   ;;  %v1604_v3 = vld [vmem:[#allocation2 + $0x180] ss:$8 sps:$4 sm:$0xff]   ;;  %v43_v5 = vld [vmem:[%s1903_s0 + $0x10] sm:$0xff] }
  0x24   :  { %889 = vmatpush1.bf16.msra.mxu1 %v1544_v23  ;;  %849 = vmatprep.subr.bf16.mxu0 %v1545_v24  ;;  %v1607_v6 = vld [vmem:[#allocation2 + $0x274] ss:$8 sps:$4 sm:$0xff]   ;;  %v51_v9 = vpack.c.bf16 %v43_v5, %v43_v5  ;;  %v1605_v10 = vld [vmem:[#allocation2 + $0x270] ss:$8 sps:$4 sm:$0xff]   ;;  %v1613_v12 = vld [vmem:[#allocation2 + $0x264] ss:$8 sps:$4 sm:$0xff]  }
  0x25   :  { %890 = vmatprep.subr.bf16.mxu1 %v1547_v25  ;;  %v1610_v7 = vld [vmem:[#allocation2 + $0x374] ss:$8 sps:$4 sm:$0xff]   ;;  %v1608_v11 = vld [vmem:[#allocation2 + $0x370] ss:$8 sps:$4 sm:$0xff]   ;;  %v1616_v13 = vld [vmem:[#allocation2 + $0x364] ss:$8 sps:$4 sm:$0xff]  }
  0x26   :  { %v1611_v14 = vld [vmem:[#allocation2 + $0x260] ss:$8 sps:$4 sm:$0xff]   ;;  %v1619_v16 = vld [vmem:[#allocation2 + $0x254] ss:$8 sps:$4 sm:$0xff]   ;;  %v1617_v18 = vld [vmem:[#allocation2 + $0x250] ss:$8 sps:$4 sm:$0xff]  }
  0x27   :  { %850 = vmatpush1.bf16.msra.mxu0 %v1549_v26  ;;  %v1614_v15 = vld [vmem:[#allocation2 + $0x360] ss:$8 sps:$4 sm:$0xff]   ;;  %v1622_v17 = vld [vmem:[#allocation2 + $0x354] ss:$8 sps:$4 sm:$0xff]   ;;  %v1620_v19 = vld [vmem:[#allocation2 + $0x350] ss:$8 sps:$4 sm:$0xff]  }
  0x28   :  { %891 = vmatpush1.bf16.msra.mxu1 %v1550_v27  ;;  %851 = vmatprep.subr.bf16.mxu0 %v1551_v28  ;;  %v1625_v20 = vld [vmem:[#allocation2 + $0x244] ss:$8 sps:$4 sm:$0xff]   ;;  %v1623_v22 = vld [vmem:[#allocation2 + $0x240] ss:$8 sps:$4 sm:$0xff]   ;;  %v1631_v24 = vld [vmem:[#allocation2 + $0x234] ss:$8 sps:$4 sm:$0xff]  }
  0x29   :  { %892 = vmatprep.subr.bf16.mxu1 %v1553_v29  ;;  %v1628_v21 = vld [vmem:[#allocation2 + $0x344] ss:$8 sps:$4 sm:$0xff]   ;;  %v1626_v23 = vld [vmem:[#allocation2 + $0x340] ss:$8 sps:$4 sm:$0xff]   ;;  %v1634_v25 = vld [vmem:[#allocation2 + $0x334] ss:$8 sps:$4 sm:$0xff]  }
  0x2a   :  { %v1629_v26 = vld [vmem:[#allocation2 + $0x230] ss:$8 sps:$4 sm:$0xff]   ;;  %v1637_v28 = vld [vmem:[#allocation2 + $0x224] ss:$8 sps:$4 sm:$0xff]   ;;  %v1659_v50 = vld [vmem:[#allocation2 + $0x2e0] ss:$8 sps:$4 sm:$0xff]  }
  0x2b   :  { %852 = vmatpush1.bf16.msra.mxu0 %v1555_v30  ;;  %v1632_v27 = vld [vmem:[#allocation2 + $0x330] ss:$8 sps:$4 sm:$0xff]   ;;  %v1640_v29 = vld [vmem:[#allocation2 + $0x324] ss:$8 sps:$4 sm:$0xff]   ;;  %v1635_v30 = vld [vmem:[#allocation2 + $0x220] ss:$8 sps:$4 sm:$0xff]  }
  0x2c   :  { %893 = vmatpush1.bf16.msra.mxu1 %v1556_v31  ;;  %853 = vmatprep.subr.bf16.mxu0 %v1557_v32  ;;  %v1638_v31 = vld [vmem:[#allocation2 + $0x320] ss:$8 sps:$4 sm:$0xff]   ;;  %v1643_v32 = vld [vmem:[#allocation2 + $0x214] ss:$8 sps:$4 sm:$0xff]   ;;  %v1653_v46 = vld [vmem:[#allocation2 + $0x2f0] ss:$8 sps:$4 sm:$0xff]  }
  0x2d   :  { %894 = vmatprep.subr.bf16.mxu1 %v1559_v33  ;;  %v1646_v33 = vld [vmem:[#allocation2 + $0x314] ss:$8 sps:$4 sm:$0xff]   ;;  %v1664_v49 = vld [vmem:[#allocation2 + $0x3e4] ss:$8 sps:$4 sm:$0xff]  }
  0x2e   :  { %v1667_v52 = vld [vmem:[#allocation2 + $0x2d4] ss:$8 sps:$4 sm:$0xff]  }
  0x2f   :  { %854 = vmatpush2.bf16.msra.mxu0 %v1561_v34  ;;  %v1641_v34 = vld [vmem:[#allocation2 + $0x210] ss:$8 sps:$4 sm:$0xff]   ;;  %v1691_v4 = vld [vmem:[#allocation2 + $0x294] ss:$8 sps:$4 sm:$0xff]  }
  0x30   :  { %895 = vmatpush2.bf16.msra.mxu1 %v1562_v35  ;;  %855 = vmatprep.subr.bf16.mxu0 %v1563_v36  ;;  %v46_v35 = vld [vmem:[%s1903_s0 + $0x28] sm:$0xff]  ;;  %v1644_v36 = vld [vmem:[#allocation2 + $0x310] ss:$8 sps:$4 sm:$0xff]   ;;  %v1694_v5 = vld [vmem:[#allocation2 + $0x394] ss:$8 sps:$4 sm:$0xff]  }
  0x31   :  { %896 = vmatprep.subr.bf16.mxu1 %v1565_v37  ;;  %v1649_v37 = vld [vmem:[#allocation2 + $0x204] ss:$8 sps:$4 sm:$0xff]  }
  0x33   :  { %856 = vmatpush2.bf16.msra.mxu0 %v1567_v38  ;;  %v54_v38 = vpack.c.bf16 %v46_v35, %v46_v35  ;;  %v1719_v35 = vld [vmem:[%s1908_s5 + $0x28] sm:$0xff]  }
  0x34   :  { %897 = vmatpush2.bf16.msra.mxu1 %v1568_v39  ;;  %857 = vmatprep.subr.bf16.mxu0 %v1569_v40  ;;  %v48_v39 = vld [vmem:[%s1903_s0 + $0x38] sm:$0xff]  ;;  %v1652_v40 = vld [vmem:[#allocation2 + $0x304] ss:$8 sps:$4 sm:$0xff]  }
  0x35   :  { %898 = vmatprep.subr.bf16.mxu1 %v1571_v41  ;;  %v56_v41 = vpack.c.bf16 %v48_v39, %v48_v39 }
  0x37   :  { %858 = vmatpush2.bf16.msra.mxu0 %v1573_v42  ;;  %v1647_v42 = vld [vmem:[#allocation2 + $0x200] ss:$8 sps:$4 sm:$0xff]  }
  0x38   :  { %899 = vmatpush2.bf16.msra.mxu1 %v1574_v43  ;;  %859 = vmatprep.subr.bf16.mxu0 %v1575_v44  ;;  %v1650_v43 = vld [vmem:[#allocation2 + $0x300] ss:$8 sps:$4 sm:$0xff]   ;;  %v1655_v44 = vld [vmem:[#allocation2 + $0x2f4] ss:$8 sps:$4 sm:$0xff]  }
  0x39   :  { %900 = vmatprep.subr.bf16.mxu1 %v1577_v45  ;;  %v1658_v45 = vld [vmem:[#allocation2 + $0x3f4] ss:$8 sps:$4 sm:$0xff]  }
  0x3b   :  { %860 = vmatpush2.bf16.msra.mxu0 %v1579_v47  ;;  %v1656_v47 = vld [vmem:[#allocation2 + $0x3f0] ss:$8 sps:$4 sm:$0xff]  }
  0x3c   :  { %901 = vmatpush2.bf16.msra.mxu1 %v1580_v48  ;;  %861 = vmatprep.subr.bf16.mxu0 %v1581_v51  ;;  %v1661_v48 = vld [vmem:[#allocation2 + $0x2e4] ss:$8 sps:$4 sm:$0xff]   ;;  %v1662_v51 = vld [vmem:[#allocation2 + $0x3e0] ss:$8 sps:$4 sm:$0xff]  }
  0x3d   :  { %902 = vmatprep.subr.bf16.mxu1 %v1583_v53  ;;  %v1670_v53 = vld [vmem:[#allocation2 + $0x3d4] ss:$8 sps:$4 sm:$0xff]  }
  0x3f   :  { %862 = vmatpush2.bf16.msra.mxu0 %v1585_v54  ;;  %v1665_v54 = vld [vmem:[#allocation2 + $0x2d0] ss:$8 sps:$4 sm:$0xff]  }
  0x40   :  { %903 = vmatpush2.bf16.msra.mxu1 %v1586_v55  ;;  %863 = vmatprep.subr.bf16.mxu0 %v1587_v56  ;;  %v1668_v55 = vld [vmem:[#allocation2 + $0x3d0] ss:$8 sps:$4 sm:$0xff]   ;;  %v1673_v56 = vld [vmem:[#allocation2 + $0x2c4] ss:$8 sps:$4 sm:$0xff]  }
  0x41   :  { %904 = vmatprep.subr.bf16.mxu1 %v1589_v57  ;;  %v1676_v57 = vld [vmem:[#allocation2 + $0x3c4] ss:$8 sps:$4 sm:$0xff]  }
  0x43   :  { %864 = vmatpush2.bf16.msra.mxu0 %v1591_v58  ;;  %v1671_v58 = vld [vmem:[#allocation2 + $0x2c0] ss:$8 sps:$4 sm:$0xff]  }
  0x44   :  { %905 = vmatpush2.bf16.msra.mxu1 %v1592_v59  ;;  %865 = vmatprep.subr.bf16.mxu0 %v1593_v60  ;;  %v1674_v59 = vld [vmem:[#allocation2 + $0x3c0] ss:$8 sps:$4 sm:$0xff]   ;;  %v1679_v60 = vld [vmem:[#allocation2 + $0x2b4] ss:$8 sps:$4 sm:$0xff]  }
  0x45   :  { %906 = vmatprep.subr.bf16.mxu1 %v1595_v61  ;;  %v1682_v61 = vld [vmem:[#allocation2 + $0x3b4] ss:$8 sps:$4 sm:$0xff]  }
  0x47   :  { %866 = vmatpush2.bf16.msra.mxu0 %v1597_v62  ;;  %v1677_v62 = vld [vmem:[#allocation2 + $0x2b0] ss:$8 sps:$4 sm:$0xff]  }
  0x48   :  { %907 = vmatpush2.bf16.msra.mxu1 %v1598_v63  ;;  %867 = vmatprep.subr.bf16.mxu0 %v1599_v0  ;;  %v1680_v63 = vld [vmem:[#allocation2 + $0x3b0] ss:$8 sps:$4 sm:$0xff]   ;;  %v1685_v0 = vld [vmem:[#allocation2 + $0x2a4] ss:$8 sps:$4 sm:$0xff]  }
  0x49   :  { %908 = vmatprep.subr.bf16.mxu1 %v1601_v1  ;;  %v1688_v1 = vld [vmem:[#allocation2 + $0x3a4] ss:$8 sps:$4 sm:$0xff]  }
  0x4b   :  { %868 = vmatpush2.bf16.msra.mxu0 %v1603_v2  ;;  %v1683_v2 = vld [vmem:[#allocation2 + $0x2a0] ss:$8 sps:$4 sm:$0xff]  }
  0x4c   :  { %909 = vmatpush2.bf16.msra.mxu1 %v1604_v3  ;;  %919 = vmatprep.subr.bf16.mxu0 %v1607_v6  ;;  %v1686_v3 = vld [vmem:[#allocation2 + $0x3a0] ss:$8 sps:$4 sm:$0xff]   ;;  %v1689_v6 = vld [vmem:[#allocation2 + $0x290] ss:$8 sps:$4 sm:$0xff]  }
  0x4d   :  { %960 = vmatprep.subr.bf16.mxu1 %v1610_v7  ;;  %v1692_v7 = vld [vmem:[#allocation2 + $0x390] ss:$8 sps:$4 sm:$0xff]  }
  0x4e   :  { %870 = vmatmul.mubr.bf16.vlgmr.msra.gmra.mxu0 %v49_v8  ;;  %v1697_v8 = vld [vmem:[#allocation2 + $0x284] ss:$8 sps:$4 sm:$0xff]  }
  0x4f   :  { %911 = vmatmul.mubr.bf16.vlgmr.msra.gmra.mxu1 %v51_v9  ;;  %920 = vmatpush1.bf16.msra.mxu0 %v1605_v10  ;;  %v1700_v9 = vld [vmem:[#allocation2 + $0x384] ss:$8 sps:$4 sm:$0xff]   ;;  %v1695_v10 = vld [vmem:[#allocation2 + $0x280] ss:$8 sps:$4 sm:$0xff]  }
  0x50   :  { %961 = vmatpush1.bf16.msra.mxu1 %v1608_v11  ;;  %921 = vmatprep.subr.bf16.mxu0 %v1613_v12  ;;  %v1698_v11 = vld [vmem:[#allocation2 + $0x380] ss:$8 sps:$4 sm:$0xff]  }
  0x51   :  { %962 = vmatprep.subr.bf16.mxu1 %v1616_v13  ;;  %951 = vmatprep.mubr.bf16.mxu0 %v54_v38  ;;  %v45_v12 = vld [vmem:[%s1903_s0 + $0x20] sm:$0xff]  ;;  %v47_v13 = vld [vmem:[%s1903_s0 + $0x30] sm:$0xff] }
  0x52   :  { %992 = vmatprep.mubr.bf16.mxu1 %v56_v41 }
  0x53   :  { %922 = vmatpush1.bf16.msra.mxu0 %v1611_v14  ;;  %v53_v14 = vpack.c.bf16 %v45_v12, %v45_v12 }
  0x54   :  { %963 = vmatpush1.bf16.msra.mxu1 %v1614_v15  ;;  %923 = vmatprep.subr.bf16.mxu0 %v1619_v16  ;;  %v55_v15 = vpack.c.bf16 %v47_v13, %v47_v13  ;;  %v1701_v16 = vld [vmem:[%s1906_s3 + $0x78] sm:$0xff]   ;;  %v1427_v13 = vld [vmem:[%s1907_s4] ss:$0 sm:$0xff] }
  0x55   :  { %964 = vmatprep.subr.bf16.mxu1 %v1622_v17  ;;  %v1702_v17 = vld [vmem:[%s1906_s3 + $0x38] sm:$0xff]  }
  0x57   :  { %924 = vmatpush1.bf16.msra.mxu0 %v1617_v18  ;;  %v1703_v18 = vld [vmem:[%s1906_s3 + $0x70] sm:$0xff]  }
  0x58   :  { %965 = vmatpush1.bf16.msra.mxu1 %v1620_v19  ;;  %925 = vmatprep.subr.bf16.mxu0 %v1625_v20  ;;  %v1704_v19 = vld [vmem:[%s1906_s3 + $0x30] sm:$0xff]   ;;  %v1705_v20 = vld [vmem:[%s1906_s3 + $0x68] sm:$0xff]  }
  0x59   :  { %966 = vmatprep.subr.bf16.mxu1 %v1628_v21  ;;  %v1706_v21 = vld [vmem:[%s1906_s3 + $0x28] sm:$0xff]  }
  0x5b   :  { %926 = vmatpush1.bf16.msra.mxu0 %v1623_v22  ;;  %v1707_v22 = vld [vmem:[%s1906_s3 + $0x60] sm:$0xff]  }
  0x5c   :  { %967 = vmatpush1.bf16.msra.mxu1 %v1626_v23  ;;  %927 = vmatprep.subr.bf16.mxu0 %v1631_v24  ;;  %v1708_v23 = vld [vmem:[%s1906_s3 + $0x20] sm:$0xff]   ;;  %v1709_v24 = vld [vmem:[%s1906_s3 + $0x58] sm:$0xff]  }
  0x5d   :  { %968 = vmatprep.subr.bf16.mxu1 %v1634_v25  ;;  %v1710_v25 = vld [vmem:[%s1906_s3 + $0x18] sm:$0xff]  }
  0x5f   :  { %928 = vmatpush1.bf16.msra.mxu0 %v1629_v26  ;;  %v1711_v26 = vld [vmem:[%s1906_s3 + $0x50] sm:$0xff]  }
  0x60   :  { %969 = vmatpush1.bf16.msra.mxu1 %v1632_v27  ;;  %929 = vmatprep.subr.bf16.mxu0 %v1637_v28  ;;  %v1712_v27 = vld [vmem:[%s1906_s3 + $0x10] sm:$0xff]   ;;  %v1713_v28 = vld [vmem:[%s1906_s3 + $0x48] sm:$0xff]  }
  0x61   :  { %970 = vmatprep.subr.bf16.mxu1 %v1640_v29  ;;  %v1714_v29 = vld [vmem:[%s1906_s3 + $0x8] sm:$0xff]  }
  0x63   :  { %930 = vmatpush1.bf16.msra.mxu0 %v1635_v30  ;;  %v1715_v30 = vld [vmem:[%s1906_s3 + $0x40] sm:$0xff]  }
  0x64   :  { %971 = vmatpush1.bf16.msra.mxu1 %v1638_v31  ;;  %931 = vmatprep.subr.bf16.mxu0 %v1643_v32  ;;  %v1716_v31 = vld [vmem:[%s1906_s3] sm:$0xff]   ;;  %v1717_v32 = vld [vmem:[%s1908_s5 + $0x38] sm:$0xff]  }
  0x65   :  { %972 = vmatprep.subr.bf16.mxu1 %v1646_v33  ;;  %v1750_v33 = vmov 0.0  }
  0x67   :  { %932 = vmatpush1.bf16.msra.mxu0 %v1641_v34  ;;  %v1718_v34 = vld [vmem:[%s1908_s5 + $0x30] sm:$0xff]  }
  0x68   :  { %973 = vmatpush1.bf16.msra.mxu1 %v1644_v36  ;;  %933 = vmatprep.subr.bf16.mxu0 %v1649_v37  ;;  %v1720_v36 = vld [vmem:[%s1908_s5 + $0x20] sm:$0xff]   ;;  %v1721_v37 = vld [vmem:[%s1908_s5 + $0x18] sm:$0xff]  }
  0x69   :  { %974 = vmatprep.subr.bf16.mxu1 %v1652_v40 }
  0x6b   :  { %934 = vmatpush1.bf16.msra.mxu0 %v1647_v42 }
  0x6c   :  { %975 = vmatpush1.bf16.msra.mxu1 %v1650_v43  ;;  %935 = vmatprep.subr.bf16.mxu0 %v1655_v44 }
  0x6d   :  { %976 = vmatprep.subr.bf16.mxu1 %v1658_v45 }
  0x6f   :  { %936 = vmatpush2.bf16.msra.mxu0 %v1653_v46  ;;  %v187_v46 = vlaneseq }
  0x70   :  { %977 = vmatpush2.bf16.msra.mxu1 %v1656_v47  ;;  %937 = vmatprep.subr.bf16.mxu0 %v1661_v48 }
  0x71   :  { %978 = vmatprep.subr.bf16.mxu1 %v1664_v49  ;;  %v188_v47 = vshrl.u32 %v187_v46, 7  ;;  %v185_v49 = vld [vmem:[%s1905_s2] sm:$0x3] }
  0x73   :  { %938 = vmatpush2.bf16.msra.mxu0 %v1659_v50  ;;  %v189_v48 = vsub.s32 0, %v188_v47  ;;  %v193_v50 = vsub.s32 1, %v188_v47 }
  0x74   :  { %979 = vmatpush2.bf16.msra.mxu1 %v1662_v51  ;;  %939 = vmatprep.subr.bf16.mxu0 %v1667_v52 }
  0x75   :  { %980 = vmatprep.subr.bf16.mxu1 %v1670_v53  ;;  %v190_v51 = vrot.slane %v185_v49, %v189_v48  ;;  %v194_v52 = vrot.slane %v185_v49, %v193_v50 }
  0x77   :  { %940 = vmatpush2.bf16.msra.mxu0 %v1665_v54 }
  0x78   :  { %981 = vmatpush2.bf16.msra.mxu1 %v1668_v55  ;;  %941 = vmatprep.subr.bf16.mxu0 %v1673_v56 }
  0x79   :  { %982 = vmatprep.subr.bf16.mxu1 %v1676_v57 }
  0x7b   :  { %942 = vmatpush2.bf16.msra.mxu0 %v1671_v58 }
  0x7c   :  { %983 = vmatpush2.bf16.msra.mxu1 %v1674_v59  ;;  %943 = vmatprep.subr.bf16.mxu0 %v1679_v60 }
  0x7d   :  { %984 = vmatprep.subr.bf16.mxu1 %v1682_v61 }
  0x7f   :  { %944 = vmatpush2.bf16.msra.mxu0 %v1677_v62 }
  0x80   :  { %985 = vmatpush2.bf16.msra.mxu1 %v1680_v63  ;;  %945 = vmatprep.subr.bf16.mxu0 %v1685_v0 }
  0x81   :  { %986 = vmatprep.subr.bf16.mxu1 %v1688_v1 }
  0x83   :  { %946 = vmatpush2.bf16.msra.mxu0 %v1683_v2 }
  0x84   :  { %987 = vmatpush2.bf16.msra.mxu1 %v1686_v3  ;;  %947 = vmatprep.subr.bf16.mxu0 %v1691_v4 }
  0x85   :  { %988 = vmatprep.subr.bf16.mxu1 %v1694_v5 }
  0x87   :  { %948 = vmatpush2.bf16.msra.mxu0 %v1689_v6 }
  0x88   :  { %989 = vmatpush2.bf16.msra.mxu1 %v1692_v7  ;;  %949 = vmatprep.subr.bf16.mxu0 %v1697_v8 }
  0x89   :  { %990 = vmatprep.subr.bf16.mxu1 %v1700_v9  ;;  %v1722_v9 = vld [vmem:[%s1908_s5 + $0x10] sm:$0xff]  }
  0x8b   :  { %950 = vmatpush2.bf16.msra.mxu0 %v1695_v10  ;;  %v1723_v10 = vld [vmem:[%s1908_s5 + $0x8] sm:$0xff]  }
  0x8c   :  { %991 = vmatpush2.bf16.msra.mxu1 %v1698_v11  ;;  %1453 = vmatprep.subr.bf16.mxu0 %v1701_v16  ;;  %v1724_v11 = vld [vmem:[%s1908_s5] sm:$0xff]  }
  0x8d   :  { %1484 = vmatprep.subr.bf16.mxu1 %v1750_v33 }
  0x8e   :  { %952 = vmatmul.mubr.bf16.vlgmr.msra.gmra.mxu0 %v53_v14 }
  0x8f   :  { %993 = vmatmul.mubr.bf16.vlgmr.msra.gmra.mxu1 %v55_v15  ;;  %1454 = vmatpush3.bf16.msra.mxu0 %v1702_v17 }
  0x90   :  { %1455 = vmatprep.subr.bf16.mxu0 %v1703_v18  ;;  %1485 = vmatpush3.bf16.msra.mxu1 %v1717_v32 }
  0x91   :  { %1486 = vmatprep.subr.bf16.mxu1 %v1750_v33  ;;  %1500 = vmatprep.mubr.msk.bf16.mxu1 %vm1751_vm0, %v1750_v33 }
  0x93   :  { %1456 = vmatpush3.bf16.msra.mxu0 %v1704_v19 }
  0x94   :  { %1457 = vmatprep.subr.bf16.mxu0 %v1705_v20  ;;  %1487 = vmatpush3.bf16.msra.mxu1 %v1718_v34 }
  0x95   :  { %1488 = vmatprep.subr.bf16.mxu1 %v1750_v33 }
  0x97   :  { %1458 = vmatpush3.bf16.msra.mxu0 %v1706_v21  ;;  %v1444_v21 = vld [vmem:[%s1909_s6] ss:$0 sm:$0xff] }
  0x98   :  { %1459 = vmatprep.subr.bf16.mxu0 %v1707_v22  ;;  %1489 = vmatpush3.bf16.msra.mxu1 %v1719_v35 }
  0x99   :  { %1490 = vmatprep.subr.bf16.mxu1 %v1750_v33 }
  0x9b   :  { %1460 = vmatpush3.bf16.msra.mxu0 %v1708_v23 }
  0x9c   :  { %1461 = vmatprep.subr.bf16.mxu0 %v1709_v24  ;;  %1491 = vmatpush3.bf16.msra.mxu1 %v1720_v36 }
  0x9d   :  { %1492 = vmatprep.subr.bf16.mxu1 %v1750_v33 }
  0x9f   :  { %1462 = vmatpush3.bf16.msra.mxu0 %v1710_v25 }
  0xa0   :  { %1463 = vmatprep.subr.bf16.mxu0 %v1711_v26  ;;  %1493 = vmatpush3.bf16.msra.mxu1 %v1721_v37 }
  0xa1   :  { %1494 = vmatprep.subr.bf16.mxu1 %v1750_v33 }
  0xa3   :  { %1464 = vmatpush3.bf16.msra.mxu0 %v1712_v27 }
  0xa4   :  { %1465 = vmatprep.subr.bf16.mxu0 %v1713_v28  ;;  %1495 = vmatpush3.bf16.msra.mxu1 %v1722_v9 }
  0xa5   :  { %1496 = vmatprep.subr.bf16.mxu1 %v1750_v33 }
  0xa7   :  { %1466 = vmatpush3.bf16.msra.mxu0 %v1714_v29 }
  0xa8   :  { %1467 = vmatprep.subr.bf16.mxu0 %v1715_v30  ;;  %1497 = vmatpush3.bf16.msra.mxu1 %v1723_v10 }
  0xa9   :  { %1498 = vmatprep.subr.bf16.mxu1 %v1750_v33 }
  0xab   :  { %1468 = vmatpush3.bf16.msra.mxu0 %v1716_v31 }
  0xac   :  { %1499 = vmatpush3.bf16.msra.mxu1 %v1724_v11 }
 0x10e   :  { %v871_v38 = vpop.f32.mrf.mxu0 }
 0x10f   :  { %v912_v39 = vpop.f32.mrf.mxu1  ;;  %v872_v53 = vadd.f32 %v871_v38, %v190_v51 }
 0x110   :  { %v873_v40 = vpop.f32.mrf.mxu0 }
 0x111   :  { %v914_v41 = vpop.f32.mrf.mxu1  ;;  %v874_v54 = vadd.f32 %v873_v40, %v194_v52  ;;  %v913_v55 = vadd.f32 %v912_v39, %v872_v53 }
 0x112   :  { %v875_v42 = vpop.f32.mrf.mxu0 }
 0x113   :  { %v916_v43 = vpop.f32.mrf.mxu1  ;;  %v915_v58 = vadd.f32 %v914_v41, %v874_v54 }
 0x114   :  { %v876_v44 = vpop.f32.mrf.mxu0 }
 0x115   :  { %v917_v45 = vpop.f32.mrf.mxu1 }
 0x14e   :  { %v953_v56 = vpop.f32.mrf.mxu0 }
 0x14f   :  { %v994_v57 = vpop.f32.mrf.mxu1  ;;  %v954_v59 = vadd.f32 %v953_v56, %v913_v55 }
 0x150   :  { %v955_v60 = vpop.f32.mrf.mxu0 }
 0x151   :  { %v996_v61 = vpop.f32.mrf.mxu1  ;;  %v995_v62 = vadd.f32 %v994_v57, %v954_v59  ;;  %v956_v63 = vadd.f32 %v955_v60, %v915_v58 }
 0x152   :  { %v957_v0 = vpop.f32.mrf.mxu0 }
 0x153   :  { %v998_v1 = vpop.f32.mrf.mxu1  ;;  %v997_v2 = vadd.f32 %v996_v61, %v956_v63  ;;  %v1001_v3 = vmax.f32 %v995_v62, 0.0 }
 0x154   :  { %v958_v4 = vpop.f32.mrf.mxu0 }
 0x155   :  { %v999_v5 = vpop.f32.mrf.mxu1  ;;  %v1002_v6 = vmax.f32 %v997_v2, 0.0  ;;  %v1003_v8 = vpack.c.bf16 %v1001_v3, %v1001_v3 }
 0x157   :  { %v1004_v7 = vpack.c.bf16 %v1002_v6, %v1002_v6 }
 0x159   :  { %1172 = vmatprep.mubr.bf16.mxu0 %v1004_v7 }
 0x15a   :  { %1173 = vmatmul.mubr.bf16.vlgmr.msra.gmra.mxu0 %v1003_v8 }
 0x21a   :  { %v1469_v12 = vpop.f32.mrf.mxu0 }
 0x21c   :  { %v1470_v14 = vpop.f32.mrf.mxu0 }
 0x21d   :  { %v1471_v15 = vadd.f32 %v1470_v14, %v1469_v12 }
 0x21e   :  { %v1472_v16 = vpop.f32.mrf.mxu0 }
 0x21f   :  { %v1175_v17 = vadd.f32 %v1471_v15, %v1427_v13 }
 0x220   :  { %v1473_v18 = vpop.f32.mrf.mxu0 }
 0x221   :  { %v1180_v19 = vmax.f32 %v1175_v17, 0.0 }
 0x223   :  { %v1181_v20 = vpack.c.bf16 %v1180_v19, %v1180_v19 }
 0x225   :  { %1501 = vmatmul.mubr.bf16.vlgmr.msra.gmra.mxu1 %v1181_v20 }
 0x2e5   :  { %v1287_v22 = vpop.f32.mrf.mxu1 }
 0x2e6   :  { %v1288_v23 = vadd.f32 %v1444_v21, %v1287_v22 }
 0x2e7   :  { %v1502_v24 = vpop.f32.mrf.mxu1 }
 0x2e8   :  { %1293 = vst [vmem:[%s1910_s7] sm:$0xff] %v1288_v23 }
 0x2e9   :  { %v1290_v25 = vpop.f32.mrf.mxu1 }
 0x2eb   :  { %v1503_v26 = vpop.f32.mrf.mxu1 }
 0x2ec   :  { %1298 = vsyncpa [#allocation3], 1 }

// kernel: _forward_resident.1
= control target key start
LH: loop header
LB: loop body
LE: loop exit
PB: predicated region body
PF: predicated region fallthrough
CT: control target
= control target key end

     0   :  { %12 = vsyncpa [#allocation3], 0  ;;  %s1747_s24 = smov [#allocation2]   ;;  %s1903_s0 = inlined_call_operand.vmem [shape: f32[8,1024], index: 0, kind: input, shape index: {}]   ;;  %s1904_s1 = inlined_call_operand.hbm [shape: bf16[1024,256], index: 1, kind: input, shape index: {}]   ;;  %s1905_s2 = inlined_call_operand.vmem [shape: f32[1,256], index: 2, kind: input, shape index: {}]   ;;  %s1906_s3 = inlined_call_operand.vmem [shape: bf16[256,128], index: 3, kind: input, shape index: {}]   ;;  %s1907_s4 = inlined_call_operand.vmem [shape: f32[1,128], index: 4, kind: input, shape index: {}]   ;;  %s1908_s5 = inlined_call_operand.vmem [shape: bf16[128,128], index: 5, kind: input, shape index: {}]   ;;  %s1909_s6 = inlined_call_operand.vmem [shape: f32[1,128], index: 6, kind: input, shape index: {}]   ;;  %s1910_s7 = inlined_call_operand.vmem [shape: f32[8,128], index: 7, kind: output, shape index: {}]  }
   0x1   :  { %s20_s25 = sshll.u32 %s1747_s24, 4  ;;  %s21_s25 = int_to_ptr.vmem [resolvable:$true] %s20_s25 }
   0x2   :  { %s1733_s26 = scalar_lea.vmem %s21_s25, 16384  ;;  %p1738_p1 = scmp.lt.s32.totalorder %s21_s25, %s21_s25 }
   0x3   :  { %p1734_p0 = scmp.ne.s32.totalorder %s21_s25, %s1733_s26  ;;  %p1739_p2 = scmp.lt.s32.totalorder %s1733_s26, %s1733_s26 }
   0x5   :  { %p1740_p3 = por %p1739_p2, %p1738_p1 }
   0x7   :  { %p1741_p4 = pnand %p1740_p3, %p1734_p0 }
   0x9   :  { %1744 = shalt.err (!%p1741_p4)
}
   0xa   :  { %s1748_s27 = smov 128   ;;  %s1749_s28 = smov 8  }
   0xb   :  { %26 = dma.hbm_to_vmem [thread:$0]  %s1904_s1, 16384, %s21_s25, [#allocation3], %s1748_s27, %s1748_s27, %s1749_s28  }
   0xc   :  { %1745 = dma.done.wait [#allocation3], 16384  }
   0xd   :  { %1746 = vsyncadd [#allocation3], 4294950912  ;;  %v1509_v0 = vld [vmem:[#allocation2 + $0x74] ss:$8 sps:$4 sm:$0xff]   ;;  %v1513_v2 = vld [vmem:[#allocation2 + $0x70] ss:$8 sps:$4 sm:$0xff]  }
   0xe   :  { %v1511_v1 = vld [vmem:[#allocation2 + $0x174] ss:$8 sps:$4 sm:$0xff]   ;;  %837 = vmatprep.subr.bf16.mxu0 %v1509_v0  ;;  %v1514_v3 = vld [vmem:[#allocation2 + $0x170] ss:$8 sps:$4 sm:$0xff]   ;;  %v1515_v4 = vld [vmem:[#allocation2 + $0x64] ss:$8 sps:$4 sm:$0xff]  }
   0xf   :  { %878 = vmatprep.subr.bf16.mxu1 %v1511_v1  ;;  %838 = vmatpush1.bf16.msra.mxu0 %v1513_v2  ;;  %v1517_v5 = vld [vmem:[#allocation2 + $0x164] ss:$8 sps:$4 sm:$0xff]   ;;  %v1519_v6 = vld [vmem:[#allocation2 + $0x60] ss:$8 sps:$4 sm:$0xff]   ;;  %v1521_v8 = vld [vmem:[#allocation2 + $0x54] ss:$8 sps:$4 sm:$0xff]  }
  0x10   :  { %879 = vmatpush1.bf16.msra.mxu1 %v1514_v3  ;;  %839 = vmatprep.subr.bf16.mxu0 %v1515_v4  ;;  %v1520_v7 = vld [vmem:[#allocation2 + $0x160] ss:$8 sps:$4 sm:$0xff]   ;;  %v1523_v9 = vld [vmem:[#allocation2 + $0x154] ss:$8 sps:$4 sm:$0xff]   ;;  %v1525_v10 = vld [vmem:[#allocation2 + $0x50] ss:$8 sps:$4 sm:$0xff]  }
  0x11   :  { %880 = vmatprep.subr.bf16.mxu1 %v1517_v5  ;;  %v1526_v11 = vld [vmem:[#allocation2 + $0x150] ss:$8 sps:$4 sm:$0xff]   ;;  %v1527_v12 = vld [vmem:[#allocation2 + $0x44] ss:$8 sps:$4 sm:$0xff]   ;;  %v1531_v14 = vld [vmem:[#allocation2 + $0x40] ss:$8 sps:$4 sm:$0xff]  }
  0x12   :  { %v1529_v13 = vld [vmem:[#allocation2 + $0x144] ss:$8 sps:$4 sm:$0xff]   ;;  %v1532_v15 = vld [vmem:[#allocation2 + $0x140] ss:$8 sps:$4 sm:$0xff]   ;;  %v1533_v16 = vld [vmem:[#allocation2 + $0x34] ss:$8 sps:$4 sm:$0xff]  }
  0x13   :  { %840 = vmatpush1.bf16.msra.mxu0 %v1519_v6  ;;  %v1535_v17 = vld [vmem:[#allocation2 + $0x134] ss:$8 sps:$4 sm:$0xff]   ;;  %v1537_v18 = vld [vmem:[#allocation2 + $0x30] ss:$8 sps:$4 sm:$0xff]   ;;  %v1539_v20 = vld [vmem:[#allocation2 + $0x24] ss:$8 sps:$4 sm:$0xff]  }
  0x14   :  { %881 = vmatpush1.bf16.msra.mxu1 %v1520_v7  ;;  %841 = vmatprep.subr.bf16.mxu0 %v1521_v8  ;;  %v1538_v19 = vld [vmem:[#allocation2 + $0x130] ss:$8 sps:$4 sm:$0xff]   ;;  %v1541_v21 = vld [vmem:[#allocation2 + $0x124] ss:$8 sps:$4 sm:$0xff]   ;;  %v1543_v22 = vld [vmem:[#allocation2 + $0x20] ss:$8 sps:$4 sm:$0xff]  }
  0x15   :  { %882 = vmatprep.subr.bf16.mxu1 %v1523_v9  ;;  %v1544_v23 = vld [vmem:[#allocation2 + $0x120] ss:$8 sps:$4 sm:$0xff]   ;;  %v1545_v24 = vld [vmem:[#allocation2 + $0x14] ss:$8 sps:$4 sm:$0xff]   ;;  %v1549_v26 = vld [vmem:[#allocation2 + $0x10] ss:$8 sps:$4 sm:$0xff]  }
  0x16   :  { %v1547_v25 = vld [vmem:[#allocation2 + $0x114] ss:$8 sps:$4 sm:$0xff]   ;;  %v1550_v27 = vld [vmem:[#allocation2 + $0x110] ss:$8 sps:$4 sm:$0xff]   ;;  %v1551_v28 = vld [vmem:[#allocation2 + $0x4] ss:$8 sps:$4 sm:$0xff]  }
  0x17   :  { %842 = vmatpush1.bf16.msra.mxu0 %v1525_v10  ;;  %v1553_v29 = vld [vmem:[#allocation2 + $0x104] ss:$8 sps:$4 sm:$0xff]   ;;  %v1555_v30 = vld [vmem:[#allocation2] ss:$8 sps:$4 sm:$0xff]   ;;  %v1557_v32 = vld [vmem:[#allocation2 + $0xf4] ss:$8 sps:$4 sm:$0xff]  }
  0x18   :  { %883 = vmatpush1.bf16.msra.mxu1 %v1526_v11  ;;  %843 = vmatprep.subr.bf16.mxu0 %v1527_v12  ;;  %v1556_v31 = vld [vmem:[#allocation2 + $0x100] ss:$8 sps:$4 sm:$0xff]   ;;  %v1559_v33 = vld [vmem:[#allocation2 + $0x1f4] ss:$8 sps:$4 sm:$0xff]   ;;  %v1561_v34 = vld [vmem:[#allocation2 + $0xf0] ss:$8 sps:$4 sm:$0xff]  }
  0x19   :  { %884 = vmatprep.subr.bf16.mxu1 %v1529_v13  ;;  %v1562_v35 = vld [vmem:[#allocation2 + $0x1f0] ss:$8 sps:$4 sm:$0xff]   ;;  %v1563_v36 = vld [vmem:[#allocation2 + $0xe4] ss:$8 sps:$4 sm:$0xff]   ;;  %v1567_v38 = vld [vmem:[#allocation2 + $0xe0] ss:$8 sps:$4 sm:$0xff]  }
  0x1a   :  { %v1565_v37 = vld [vmem:[#allocation2 + $0x1e4] ss:$8 sps:$4 sm:$0xff]   ;;  %v1568_v39 = vld [vmem:[#allocation2 + $0x1e0] ss:$8 sps:$4 sm:$0xff]   ;;  %v1569_v40 = vld [vmem:[#allocation2 + $0xd4] ss:$8 sps:$4 sm:$0xff]  }
  0x1b   :  { %844 = vmatpush1.bf16.msra.mxu0 %v1531_v14  ;;  %v1571_v41 = vld [vmem:[#allocation2 + $0x1d4] ss:$8 sps:$4 sm:$0xff]   ;;  %v1573_v42 = vld [vmem:[#allocation2 + $0xd0] ss:$8 sps:$4 sm:$0xff]   ;;  %v1575_v44 = vld [vmem:[#allocation2 + $0xc4] ss:$8 sps:$4 sm:$0xff]  }
  0x1c   :  { %885 = vmatpush1.bf16.msra.mxu1 %v1532_v15  ;;  %845 = vmatprep.subr.bf16.mxu0 %v1533_v16  ;;  %v1574_v43 = vld [vmem:[#allocation2 + $0x1d0] ss:$8 sps:$4 sm:$0xff]   ;;  %v1577_v45 = vld [vmem:[#allocation2 + $0x1c4] ss:$8 sps:$4 sm:$0xff]   ;;  %v1579_v47 = vld [vmem:[#allocation2 + $0xc0] ss:$8 sps:$4 sm:$0xff]  }
  0x1d   :  { %886 = vmatprep.subr.bf16.mxu1 %v1535_v17  ;;  %v42_v46 = vld [vmem:[%s1903_s0 + $0x8] sm:$0xff]  ;;  %v44_v50 = vld [vmem:[%s1903_s0 + $0x18] sm:$0xff]  ;;  %v41_v4 = vld [vmem:[%s1903_s0] sm:$0xff]  ;;  %vm1751_vm0 = vmmov 0  }
  0x1e   :  { %v1580_v48 = vld [vmem:[#allocation2 + $0x1c0] ss:$8 sps:$4 sm:$0xff]   ;;  %v50_v49 = vpack.c.bf16 %v42_v46, %v42_v46  ;;  %v1581_v51 = vld [vmem:[#allocation2 + $0xb4] ss:$8 sps:$4 sm:$0xff]   ;;  %v52_v52 = vpack.c.bf16 %v44_v50, %v44_v50  ;;  %v1585_v54 = vld [vmem:[#allocation2 + $0xb0] ss:$8 sps:$4 sm:$0xff]   ;;  %v49_v8 = vpack.c.bf16 %v41_v4, %v41_v4 }
  0x1f   :  { %846 = vmatpush1.bf16.msra.mxu0 %v1537_v18  ;;  %v1583_v53 = vld [vmem:[#allocation2 + $0x1b4] ss:$8 sps:$4 sm:$0xff]   ;;  %v1586_v55 = vld [vmem:[#allocation2 + $0x1b0] ss:$8 sps:$4 sm:$0xff]   ;;  %v1587_v56 = vld [vmem:[#allocation2 + $0xa4] ss:$8 sps:$4 sm:$0xff]  }
  0x20   :  { %887 = vmatpush1.bf16.msra.mxu1 %v1538_v19  ;;  %847 = vmatprep.subr.bf16.mxu0 %v1539_v20  ;;  %v1589_v57 = vld [vmem:[#allocation2 + $0x1a4] ss:$8 sps:$4 sm:$0xff]   ;;  %v1591_v58 = vld [vmem:[#allocation2 + $0xa0] ss:$8 sps:$4 sm:$0xff]   ;;  %v1593_v60 = vld [vmem:[#allocation2 + $0x94] ss:$8 sps:$4 sm:$0xff]  }
  0x21   :  { %888 = vmatprep.subr.bf16.mxu1 %v1541_v21  ;;  %869 = vmatprep.mubr.bf16.mxu0 %v50_v49  ;;  %v1592_v59 = vld [vmem:[#allocation2 + $0x1a0] ss:$8 sps:$4 sm:$0xff]   ;;  %v1595_v61 = vld [vmem:[#allocation2 + $0x194] ss:$8 sps:$4 sm:$0xff]   ;;  %v1597_v62 = vld [vmem:[#allocation2 + $0x90] ss:$8 sps:$4 sm:$0xff]  }
  0x22   :  { %910 = vmatprep.mubr.bf16.mxu1 %v52_v52  ;;  %v1598_v63 = vld [vmem:[#allocation2 + $0x190] ss:$8 sps:$4 sm:$0xff]   ;;  %v1599_v0 = vld [vmem:[#allocation2 + $0x84] ss:$8 sps:$4 sm:$0xff]   ;;  %v1603_v2 = vld [vmem:[#allocation2 + $0x80] ss:$8 sps:$4 sm:$0xff]  }
  0x23   :  { %848 = vmatpush1.bf16.msra.mxu0 %v1543_v22  ;;  %v1601_v1 = vld [vmem:[#allocation2 + $0x184] ss:$8 sps:$4 sm:$0xff]   ;;  %v1604_v3 = vld [vmem:[#allocation2 + $0x180] ss:$8 sps:$4 sm:$0xff]   ;;  %v43_v5 = vld [vmem:[%s1903_s0 + $0x10] sm:$0xff] }
  0x24   :  { %889 = vmatpush1.bf16.msra.mxu1 %v1544_v23  ;;  %849 = vmatprep.subr.bf16.mxu0 %v1545_v24  ;;  %v1607_v6 = vld [vmem:[#allocation2 + $0x274] ss:$8 sps:$4 sm:$0xff]   ;;  %v51_v9 = vpack.c.bf16 %v43_v5, %v43_v5  ;;  %v1605_v10 = vld [vmem:[#allocation2 + $0x270] ss:$8 sps:$4 sm:$0xff]   ;;  %v1613_v12 = vld [vmem:[#allocation2 + $0x264] ss:$8 sps:$4 sm:$0xff]  }
  0x25   :  { %890 = vmatprep.subr.bf16.mxu1 %v1547_v25  ;;  %v1610_v7 = vld [vmem:[#allocation2 + $0x374] ss:$8 sps:$4 sm:$0xff]   ;;  %v1608_v11 = vld [vmem:[#allocation2 + $0x370] ss:$8 sps:$4 sm:$0xff]   ;;  %v1616_v13 = vld [vmem:[#allocation2 + $0x364] ss:$8 sps:$4 sm:$0xff]  }
  0x26   :  { %v1611_v14 = vld [vmem:[#allocation2 + $0x260] ss:$8 sps:$4 sm:$0xff]   ;;  %v1619_v16 = vld [vmem:[#allocation2 + $0x254] ss:$8 sps:$4 sm:$0xff]   ;;  %v1617_v18 = vld [vmem:[#allocation2 + $0x250] ss:$8 sps:$4 sm:$0xff]  }
  0x27   :  { %850 = vmatpush1.bf16.msra.mxu0 %v1549_v26  ;;  %v1614_v15 = vld [vmem:[#allocation2 + $0x360] ss:$8 sps:$4 sm:$0xff]   ;;  %v1622_v17 = vld [vmem:[#allocation2 + $0x354] ss:$8 sps:$4 sm:$0xff]   ;;  %v1620_v19 = vld [vmem:[#allocation2 + $0x350] ss:$8 sps:$4 sm:$0xff]  }
  0x28   :  { %891 = vmatpush1.bf16.msra.mxu1 %v1550_v27  ;;  %851 = vmatprep.subr.bf16.mxu0 %v1551_v28  ;;  %v1625_v20 = vld [vmem:[#allocation2 + $0x244] ss:$8 sps:$4 sm:$0xff]   ;;  %v1623_v22 = vld [vmem:[#allocation2 + $0x240] ss:$8 sps:$4 sm:$0xff]   ;;  %v1631_v24 = vld [vmem:[#allocation2 + $0x234] ss:$8 sps:$4 sm:$0xff]  }
  0x29   :  { %892 = vmatprep.subr.bf16.mxu1 %v1553_v29  ;;  %v1628_v21 = vld [vmem:[#allocation2 + $0x344] ss:$8 sps:$4 sm:$0xff]   ;;  %v1626_v23 = vld [vmem:[#allocation2 + $0x340] ss:$8 sps:$4 sm:$0xff]   ;;  %v1634_v25 = vld [vmem:[#allocation2 + $0x334] ss:$8 sps:$4 sm:$0xff]  }
  0x2a   :  { %v1629_v26 = vld [vmem:[#allocation2 + $0x230] ss:$8 sps:$4 sm:$0xff]   ;;  %v1637_v28 = vld [vmem:[#allocation2 + $0x224] ss:$8 sps:$4 sm:$0xff]   ;;  %v1659_v50 = vld [vmem:[#allocation2 + $0x2e0] ss:$8 sps:$4 sm:$0xff]  }
  0x2b   :  { %852 = vmatpush1.bf16.msra.mxu0 %v1555_v30  ;;  %v1632_v27 = vld [vmem:[#allocation2 + $0x330] ss:$8 sps:$4 sm:$0xff]   ;;  %v1640_v29 = vld [vmem:[#allocation2 + $0x324] ss:$8 sps:$4 sm:$0xff]   ;;  %v1635_v30 = vld [vmem:[#allocation2 + $0x220] ss:$8 sps:$4 sm:$0xff]  }
  0x2c   :  { %893 = vmatpush1.bf16.msra.mxu1 %v1556_v31  ;;  %853 = vmatprep.subr.bf16.mxu0 %v1557_v32  ;;  %v1638_v31 = vld [vmem:[#allocation2 + $0x320] ss:$8 sps:$4 sm:$0xff]   ;;  %v1643_v32 = vld [vmem:[#allocation2 + $0x214] ss:$8 sps:$4 sm:$0xff]   ;;  %v1653_v46 = vld [vmem:[#allocation2 + $0x2f0] ss:$8 sps:$4 sm:$0xff]  }
  0x2d   :  { %894 = vmatprep.subr.bf16.mxu1 %v1559_v33  ;;  %v1646_v33 = vld [vmem:[#allocation2 + $0x314] ss:$8 sps:$4 sm:$0xff]   ;;  %v1664_v49 = vld [vmem:[#allocation2 + $0x3e4] ss:$8 sps:$4 sm:$0xff]  }
  0x2e   :  { %v1667_v52 = vld [vmem:[#allocation2 + $0x2d4] ss:$8 sps:$4 sm:$0xff]  }
  0x2f   :  { %854 = vmatpush2.bf16.msra.mxu0 %v1561_v34  ;;  %v1641_v34 = vld [vmem:[#allocation2 + $0x210] ss:$8 sps:$4 sm:$0xff]   ;;  %v1691_v4 = vld [vmem:[#allocation2 + $0x294] ss:$8 sps:$4 sm:$0xff]  }
  0x30   :  { %895 = vmatpush2.bf16.msra.mxu1 %v1562_v35  ;;  %855 = vmatprep.subr.bf16.mxu0 %v1563_v36  ;;  %v46_v35 = vld [vmem:[%s1903_s0 + $0x28] sm:$0xff]  ;;  %v1644_v36 = vld [vmem:[#allocation2 + $0x310] ss:$8 sps:$4 sm:$0xff]   ;;  %v1694_v5 = vld [vmem:[#allocation2 + $0x394] ss:$8 sps:$4 sm:$0xff]  }
  0x31   :  { %896 = vmatprep.subr.bf16.mxu1 %v1565_v37  ;;  %v1649_v37 = vld [vmem:[#allocation2 + $0x204] ss:$8 sps:$4 sm:$0xff]  }
  0x33   :  { %856 = vmatpush2.bf16.msra.mxu0 %v1567_v38  ;;  %v54_v38 = vpack.c.bf16 %v46_v35, %v46_v35  ;;  %v1719_v35 = vld [vmem:[%s1908_s5 + $0x28] sm:$0xff]  }
  0x34   :  { %897 = vmatpush2.bf16.msra.mxu1 %v1568_v39  ;;  %857 = vmatprep.subr.bf16.mxu0 %v1569_v40  ;;  %v48_v39 = vld [vmem:[%s1903_s0 + $0x38] sm:$0xff]  ;;  %v1652_v40 = vld [vmem:[#allocation2 + $0x304] ss:$8 sps:$4 sm:$0xff]  }
  0x35   :  { %898 = vmatprep.subr.bf16.mxu1 %v1571_v41  ;;  %v56_v41 = vpack.c.bf16 %v48_v39, %v48_v39 }
  0x37   :  { %858 = vmatpush2.bf16.msra.mxu0 %v1573_v42  ;;  %v1647_v42 = vld [vmem:[#allocation2 + $0x200] ss:$8 sps:$4 sm:$0xff]  }
  0x38   :  { %899 = vmatpush2.bf16.msra.mxu1 %v1574_v43  ;;  %859 = vmatprep.subr.bf16.mxu0 %v1575_v44  ;;  %v1650_v43 = vld [vmem:[#allocation2 + $0x300] ss:$8 sps:$4 sm:$0xff]   ;;  %v1655_v44 = vld [vmem:[#allocation2 + $0x2f4] ss:$8 sps:$4 sm:$0xff]  }
  0x39   :  { %900 = vmatprep.subr.bf16.mxu1 %v1577_v45  ;;  %v1658_v45 = vld [vmem:[#allocation2 + $0x3f4] ss:$8 sps:$4 sm:$0xff]  }
  0x3b   :  { %860 = vmatpush2.bf16.msra.mxu0 %v1579_v47  ;;  %v1656_v47 = vld [vmem:[#allocation2 + $0x3f0] ss:$8 sps:$4 sm:$0xff]  }
  0x3c   :  { %901 = vmatpush2.bf16.msra.mxu1 %v1580_v48  ;;  %861 = vmatprep.subr.bf16.mxu0 %v1581_v51  ;;  %v1661_v48 = vld [vmem:[#allocation2 + $0x2e4] ss:$8 sps:$4 sm:$0xff]   ;;  %v1662_v51 = vld [vmem:[#allocation2 + $0x3e0] ss:$8 sps:$4 sm:$0xff]  }
  0x3d   :  { %902 = vmatprep.subr.bf16.mxu1 %v1583_v53  ;;  %v1670_v53 = vld [vmem:[#allocation2 + $0x3d4] ss:$8 sps:$4 sm:$0xff]  }
  0x3f   :  { %862 = vmatpush2.bf16.msra.mxu0 %v1585_v54  ;;  %v1665_v54 = vld [vmem:[#allocation2 + $0x2d0] ss:$8 sps:$4 sm:$0xff]  }
  0x40   :  { %903 = vmatpush2.bf16.msra.mxu1 %v1586_v55  ;;  %863 = vmatprep.subr.bf16.mxu0 %v1587_v56  ;;  %v1668_v55 = vld [vmem:[#allocation2 + $0x3d0] ss:$8 sps:$4 sm:$0xff]   ;;  %v1673_v56 = vld [vmem:[#allocation2 + $0x2c4] ss:$8 sps:$4 sm:$0xff]  }
  0x41   :  { %904 = vmatprep.subr.bf16.mxu1 %v1589_v57  ;;  %v1676_v57 = vld [vmem:[#allocation2 + $0x3c4] ss:$8 sps:$4 sm:$0xff]  }
  0x43   :  { %864 = vmatpush2.bf16.msra.mxu0 %v1591_v58  ;;  %v1671_v58 = vld [vmem:[#allocation2 + $0x2c0] ss:$8 sps:$4 sm:$0xff]  }
  0x44   :  { %905 = vmatpush2.bf16.msra.mxu1 %v1592_v59  ;;  %865 = vmatprep.subr.bf16.mxu0 %v1593_v60  ;;  %v1674_v59 = vld [vmem:[#allocation2 + $0x3c0] ss:$8 sps:$4 sm:$0xff]   ;;  %v1679_v60 = vld [vmem:[#allocation2 + $0x2b4] ss:$8 sps:$4 sm:$0xff]  }
  0x45   :  { %906 = vmatprep.subr.bf16.mxu1 %v1595_v61  ;;  %v1682_v61 = vld [vmem:[#allocation2 + $0x3b4] ss:$8 sps:$4 sm:$0xff]  }
  0x47   :  { %866 = vmatpush2.bf16.msra.mxu0 %v1597_v62  ;;  %v1677_v62 = vld [vmem:[#allocation2 + $0x2b0] ss:$8 sps:$4 sm:$0xff]  }
  0x48   :  { %907 = vmatpush2.bf16.msra.mxu1 %v1598_v63  ;;  %867 = vmatprep.subr.bf16.mxu0 %v1599_v0  ;;  %v1680_v63 = vld [vmem:[#allocation2 + $0x3b0] ss:$8 sps:$4 sm:$0xff]   ;;  %v1685_v0 = vld [vmem:[#allocation2 + $0x2a4] ss:$8 sps:$4 sm:$0xff]  }
  0x49   :  { %908 = vmatprep.subr.bf16.mxu1 %v1601_v1  ;;  %v1688_v1 = vld [vmem:[#allocation2 + $0x3a4] ss:$8 sps:$4 sm:$0xff]  }
  0x4b   :  { %868 = vmatpush2.bf16.msra.mxu0 %v1603_v2  ;;  %v1683_v2 = vld [vmem:[#allocation2 + $0x2a0] ss:$8 sps:$4 sm:$0xff]  }
  0x4c   :  { %909 = vmatpush2.bf16.msra.mxu1 %v1604_v3  ;;  %919 = vmatprep.subr.bf16.mxu0 %v1607_v6  ;;  %v1686_v3 = vld [vmem:[#allocation2 + $0x3a0] ss:$8 sps:$4 sm:$0xff]   ;;  %v1689_v6 = vld [vmem:[#allocation2 + $0x290] ss:$8 sps:$4 sm:$0xff]  }
  0x4d   :  { %960 = vmatprep.subr.bf16.mxu1 %v1610_v7  ;;  %v1692_v7 = vld [vmem:[#allocation2 + $0x390] ss:$8 sps:$4 sm:$0xff]  }
  0x4e   :  { %870 = vmatmul.mubr.bf16.vlgmr.msra.gmra.mxu0 %v49_v8  ;;  %v1697_v8 = vld [vmem:[#allocation2 + $0x284] ss:$8 sps:$4 sm:$0xff]  }
  0x4f   :  { %911 = vmatmul.mubr.bf16.vlgmr.msra.gmra.mxu1 %v51_v9  ;;  %920 = vmatpush1.bf16.msra.mxu0 %v1605_v10  ;;  %v1700_v9 = vld [vmem:[#allocation2 + $0x384] ss:$8 sps:$4 sm:$0xff]   ;;  %v1695_v10 = vld [vmem:[#allocation2 + $0x280] ss:$8 sps:$4 sm:$0xff]  }
  0x50   :  { %961 = vmatpush1.bf16.msra.mxu1 %v1608_v11  ;;  %921 = vmatprep.subr.bf16.mxu0 %v1613_v12  ;;  %v1698_v11 = vld [vmem:[#allocation2 + $0x380] ss:$8 sps:$4 sm:$0xff]  }
  0x51   :  { %962 = vmatprep.subr.bf16.mxu1 %v1616_v13  ;;  %951 = vmatprep.mubr.bf16.mxu0 %v54_v38  ;;  %v45_v12 = vld [vmem:[%s1903_s0 + $0x20] sm:$0xff]  ;;  %v47_v13 = vld [vmem:[%s1903_s0 + $0x30] sm:$0xff] }
  0x52   :  { %992 = vmatprep.mubr.bf16.mxu1 %v56_v41 }
  0x53   :  { %922 = vmatpush1.bf16.msra.mxu0 %v1611_v14  ;;  %v53_v14 = vpack.c.bf16 %v45_v12, %v45_v12 }
  0x54   :  { %963 = vmatpush1.bf16.msra.mxu1 %v1614_v15  ;;  %923 = vmatprep.subr.bf16.mxu0 %v1619_v16  ;;  %v55_v15 = vpack.c.bf16 %v47_v13, %v47_v13  ;;  %v1701_v16 = vld [vmem:[%s1906_s3 + $0x78] sm:$0xff]   ;;  %v1427_v13 = vld [vmem:[%s1907_s4] ss:$0 sm:$0xff] }
  0x55   :  { %964 = vmatprep.subr.bf16.mxu1 %v1622_v17  ;;  %v1702_v17 = vld [vmem:[%s1906_s3 + $0x38] sm:$0xff]  }
  0x57   :  { %924 = vmatpush1.bf16.msra.mxu0 %v1617_v18  ;;  %v1703_v18 = vld [vmem:[%s1906_s3 + $0x70] sm:$0xff]  }
  0x58   :  { %965 = vmatpush1.bf16.msra.mxu1 %v1620_v19  ;;  %925 = vmatprep.subr.bf16.mxu0 %v1625_v20  ;;  %v1704_v19 = vld [vmem:[%s1906_s3 + $0x30] sm:$0xff]   ;;  %v1705_v20 = vld [vmem:[%s1906_s3 + $0x68] sm:$0xff]  }
  0x59   :  { %966 = vmatprep.subr.bf16.mxu1 %v1628_v21  ;;  %v1706_v21 = vld [vmem:[%s1906_s3 + $0x28] sm:$0xff]  }
  0x5b   :  { %926 = vmatpush1.bf16.msra.mxu0 %v1623_v22  ;;  %v1707_v22 = vld [vmem:[%s1906_s3 + $0x60] sm:$0xff]  }
  0x5c   :  { %967 = vmatpush1.bf16.msra.mxu1 %v1626_v23  ;;  %927 = vmatprep.subr.bf16.mxu0 %v1631_v24  ;;  %v1708_v23 = vld [vmem:[%s1906_s3 + $0x20] sm:$0xff]   ;;  %v1709_v24 = vld [vmem:[%s1906_s3 + $0x58] sm:$0xff]  }
  0x5d   :  { %968 = vmatprep.subr.bf16.mxu1 %v1634_v25  ;;  %v1710_v25 = vld [vmem:[%s1906_s3 + $0x18] sm:$0xff]  }
  0x5f   :  { %928 = vmatpush1.bf16.msra.mxu0 %v1629_v26  ;;  %v1711_v26 = vld [vmem:[%s1906_s3 + $0x50] sm:$0xff]  }
  0x60   :  { %969 = vmatpush1.bf16.msra.mxu1 %v1632_v27  ;;  %929 = vmatprep.subr.bf16.mxu0 %v1637_v28  ;;  %v1712_v27 = vld [vmem:[%s1906_s3 + $0x10] sm:$0xff]   ;;  %v1713_v28 = vld [vmem:[%s1906_s3 + $0x48] sm:$0xff]  }
  0x61   :  { %970 = vmatprep.subr.bf16.mxu1 %v1640_v29  ;;  %v1714_v29 = vld [vmem:[%s1906_s3 + $0x8] sm:$0xff]  }
  0x63   :  { %930 = vmatpush1.bf16.msra.mxu0 %v1635_v30  ;;  %v1715_v30 = vld [vmem:[%s1906_s3 + $0x40] sm:$0xff]  }
  0x64   :  { %971 = vmatpush1.bf16.msra.mxu1 %v1638_v31  ;;  %931 = vmatprep.subr.bf16.mxu0 %v1643_v32  ;;  %v1716_v31 = vld [vmem:[%s1906_s3] sm:$0xff]   ;;  %v1717_v32 = vld [vmem:[%s1908_s5 + $0x38] sm:$0xff]  }
  0x65   :  { %972 = vmatprep.subr.bf16.mxu1 %v1646_v33  ;;  %v1750_v33 = vmov 0.0  }
  0x67   :  { %932 = vmatpush1.bf16.msra.mxu0 %v1641_v34  ;;  %v1718_v34 = vld [vmem:[%s1908_s5 + $0x30] sm:$0xff]  }
  0x68   :  { %973 = vmatpush1.bf16.msra.mxu1 %v1644_v36  ;;  %933 = vmatprep.subr.bf16.mxu0 %v1649_v37  ;;  %v1720_v36 = vld [vmem:[%s1908_s5 + $0x20] sm:$0xff]   ;;  %v1721_v37 = vld [vmem:[%s1908_s5 + $0x18] sm:$0xff]  }
  0x69   :  { %974 = vmatprep.subr.bf16.mxu1 %v1652_v40 }
  0x6b   :  { %934 = vmatpush1.bf16.msra.mxu0 %v1647_v42 }
  0x6c   :  { %975 = vmatpush1.bf16.msra.mxu1 %v1650_v43  ;;  %935 = vmatprep.subr.bf16.mxu0 %v1655_v44 }
  0x6d   :  { %976 = vmatprep.subr.bf16.mxu1 %v1658_v45 }
  0x6f   :  { %936 = vmatpush2.bf16.msra.mxu0 %v1653_v46  ;;  %v187_v46 = vlaneseq }
  0x70   :  { %977 = vmatpush2.bf16.msra.mxu1 %v1656_v47  ;;  %937 = vmatprep.subr.bf16.mxu0 %v1661_v48 }
  0x71   :  { %978 = vmatprep.subr.bf16.mxu1 %v1664_v49  ;;  %v188_v47 = vshrl.u32 %v187_v46, 7  ;;  %v185_v49 = vld [vmem:[%s1905_s2] sm:$0x3] }
  0x73   :  { %938 = vmatpush2.bf16.msra.mxu0 %v1659_v50  ;;  %v189_v48 = vsub.s32 0, %v188_v47  ;;  %v193_v50 = vsub.s32 1, %v188_v47 }
  0x74   :  { %979 = vmatpush2.bf16.msra.mxu1 %v1662_v51  ;;  %939 = vmatprep.subr.bf16.mxu0 %v1667_v52 }
  0x75   :  { %980 = vmatprep.subr.bf16.mxu1 %v1670_v53  ;;  %v190_v51 = vrot.slane %v185_v49, %v189_v48  ;;  %v194_v52 = vrot.slane %v185_v49, %v193_v50 }
  0x77   :  { %940 = vmatpush2.bf16.msra.mxu0 %v1665_v54 }
  0x78   :  { %981 = vmatpush2.bf16.msra.mxu1 %v1668_v55  ;;  %941 = vmatprep.subr.bf16.mxu0 %v1673_v56 }
  0x79   :  { %982 = vmatprep.subr.bf16.mxu1 %v1676_v57 }
  0x7b   :  { %942 = vmatpush2.bf16.msra.mxu0 %v1671_v58 }
  0x7c   :  { %983 = vmatpush2.bf16.msra.mxu1 %v1674_v59  ;;  %943 = vmatprep.subr.bf16.mxu0 %v1679_v60 }
  0x7d   :  { %984 = vmatprep.subr.bf16.mxu1 %v1682_v61 }
  0x7f   :  { %944 = vmatpush2.bf16.msra.mxu0 %v1677_v62 }
  0x80   :  { %985 = vmatpush2.bf16.msra.mxu1 %v1680_v63  ;;  %945 = vmatprep.subr.bf16.mxu0 %v1685_v0 }
  0x81   :  { %986 = vmatprep.subr.bf16.mxu1 %v1688_v1 }
  0x83   :  { %946 = vmatpush2.bf16.msra.mxu0 %v1683_v2 }
  0x84   :  { %987 = vmatpush2.bf16.msra.mxu1 %v1686_v3  ;;  %947 = vmatprep.subr.bf16.mxu0 %v1691_v4 }
  0x85   :  { %988 = vmatprep.subr.bf16.mxu1 %v1694_v5 }
  0x87   :  { %948 = vmatpush2.bf16.msra.mxu0 %v1689_v6 }
  0x88   :  { %989 = vmatpush2.bf16.msra.mxu1 %v1692_v7  ;;  %949 = vmatprep.subr.bf16.mxu0 %v1697_v8 }
  0x89   :  { %990 = vmatprep.subr.bf16.mxu1 %v1700_v9  ;;  %v1722_v9 = vld [vmem:[%s1908_s5 + $0x10] sm:$0xff]  }
  0x8b   :  { %950 = vmatpush2.bf16.msra.mxu0 %v1695_v10  ;;  %v1723_v10 = vld [vmem:[%s1908_s5 + $0x8] sm:$0xff]  }
  0x8c   :  { %991 = vmatpush2.bf16.msra.mxu1 %v1698_v11  ;;  %1453 = vmatprep.subr.bf16.mxu0 %v1701_v16  ;;  %v1724_v11 = vld [vmem:[%s1908_s5] sm:$0xff]  }
  0x8d   :  { %1484 = vmatprep.subr.bf16.mxu1 %v1750_v33 }
  0x8e   :  { %952 = vmatmul.mubr.bf16.vlgmr.msra.gmra.mxu0 %v53_v14 }
  0x8f   :  { %993 = vmatmul.mubr.bf16.vlgmr.msra.gmra.mxu1 %v55_v15  ;;  %1454 = vmatpush3.bf16.msra.mxu0 %v1702_v17 }
  0x90   :  { %1455 = vmatprep.subr.bf16.mxu0 %v1703_v18  ;;  %1485 = vmatpush3.bf16.msra.mxu1 %v1717_v32 }
  0x91   :  { %1486 = vmatprep.subr.bf16.mxu1 %v1750_v33  ;;  %1500 = vmatprep.mubr.msk.bf16.mxu1 %vm1751_vm0, %v1750_v33 }
  0x93   :  { %1456 = vmatpush3.bf16.msra.mxu0 %v1704_v19 }
  0x94   :  { %1457 = vmatprep.subr.bf16.mxu0 %v1705_v20  ;;  %1487 = vmatpush3.bf16.msra.mxu1 %v1718_v34 }
  0x95   :  { %1488 = vmatprep.subr.bf16.mxu1 %v1750_v33 }
  0x97   :  { %1458 = vmatpush3.bf16.msra.mxu0 %v1706_v21  ;;  %v1444_v21 = vld [vmem:[%s1909_s6] ss:$0 sm:$0xff] }
  0x98   :  { %1459 = vmatprep.subr.bf16.mxu0 %v1707_v22  ;;  %1489 = vmatpush3.bf16.msra.mxu1 %v1719_v35 }
  0x99   :  { %1490 = vmatprep.subr.bf16.mxu1 %v1750_v33 }
  0x9b   :  { %1460 = vmatpush3.bf16.msra.mxu0 %v1708_v23 }
  0x9c   :  { %1461 = vmatprep.subr.bf16.mxu0 %v1709_v24  ;;  %1491 = vmatpush3.bf16.msra.mxu1 %v1720_v36 }
  0x9d   :  { %1492 = vmatprep.subr.bf16.mxu1 %v1750_v33 }
  0x9f   :  { %1462 = vmatpush3.bf16.msra.mxu0 %v1710_v25 }
  0xa0   :  { %1463 = vmatprep.subr.bf16.mxu0 %v1711_v26  ;;  %1493 = vmatpush3.bf16.msra.mxu1 %v1721_v37 }
  0xa1   :  { %1494 = vmatprep.subr.bf16.mxu1 %v1750_v33 }
  0xa3   :  { %1464 = vmatpush3.bf16.msra.mxu0 %v1712_v27 }
  0xa4   :  { %1465 = vmatprep.subr.bf16.mxu0 %v1713_v28  ;;  %1495 = vmatpush3.bf16.msra.mxu1 %v1722_v9 }
  0xa5   :  { %1496 = vmatprep.subr.bf16.mxu1 %v1750_v33 }
  0xa7   :  { %1466 = vmatpush3.bf16.msra.mxu0 %v1714_v29 }
  0xa8   :  { %1467 = vmatprep.subr.bf16.mxu0 %v1715_v30  ;;  %1497 = vmatpush3.bf16.msra.mxu1 %v1723_v10 }
  0xa9   :  { %1498 = vmatprep.subr.bf16.mxu1 %v1750_v33 }
  0xab   :  { %1468 = vmatpush3.bf16.msra.mxu0 %v1716_v31 }
  0xac   :  { %1499 = vmatpush3.bf16.msra.mxu1 %v1724_v11 }
 0x10e   :  { %v871_v38 = vpop.f32.mrf.mxu0 }
 0x10f   :  { %v912_v39 = vpop.f32.mrf.mxu1  ;;  %v872_v53 = vadd.f32 %v871_v38, %v190_v51 }
 0x110   :  { %v873_v40 = vpop.f32.mrf.mxu0 }
 0x111   :  { %v914_v41 = vpop.f32.mrf.mxu1  ;;  %v874_v54 = vadd.f32 %v873_v40, %v194_v52  ;;  %v913_v55 = vadd.f32 %v912_v39, %v872_v53 }
 0x112   :  { %v875_v42 = vpop.f32.mrf.mxu0 }
 0x113   :  { %v916_v43 = vpop.f32.mrf.mxu1  ;;  %v915_v58 = vadd.f32 %v914_v41, %v874_v54 }
 0x114   :  { %v876_v44 = vpop.f32.mrf.mxu0 }
 0x115   :  { %v917_v45 = vpop.f32.mrf.mxu1 }
 0x14e   :  { %v953_v56 = vpop.f32.mrf.mxu0 }
 0x14f   :  { %v994_v57 = vpop.f32.mrf.mxu1  ;;  %v954_v59 = vadd.f32 %v953_v56, %v913_v55 }
 0x150   :  { %v955_v60 = vpop.f32.mrf.mxu0 }
 0x151   :  { %v996_v61 = vpop.f32.mrf.mxu1  ;;  %v995_v62 = vadd.f32 %v994_v57, %v954_v59  ;;  %v956_v63 = vadd.f32 %v955_v60, %v915_v58 }
 0x152   :  { %v957_v0 = vpop.f32.mrf.mxu0 }
 0x153   :  { %v998_v1 = vpop.f32.mrf.mxu1  ;;  %v997_v2 = vadd.f32 %v996_v61, %v956_v63  ;;  %v1001_v3 = vmax.f32 %v995_v62, 0.0 }
 0x154   :  { %v958_v4 = vpop.f32.mrf.mxu0 }
 0x155   :  { %v999_v5 = vpop.f32.mrf.mxu1  ;;  %v1002_v6 = vmax.f32 %v997_v2, 0.0  ;;  %v1003_v8 = vpack.c.bf16 %v1001_v3, %v1001_v3 }
 0x157   :  { %v1004_v7 = vpack.c.bf16 %v1002_v6, %v1002_v6 }
 0x159   :  { %1172 = vmatprep.mubr.bf16.mxu0 %v1004_v7 }
 0x15a   :  { %1173 = vmatmul.mubr.bf16.vlgmr.msra.gmra.mxu0 %v1003_v8 }
 0x21a   :  { %v1469_v12 = vpop.f32.mrf.mxu0 }
 0x21c   :  { %v1470_v14 = vpop.f32.mrf.mxu0 }
 0x21d   :  { %v1471_v15 = vadd.f32 %v1470_v14, %v1469_v12 }
 0x21e   :  { %v1472_v16 = vpop.f32.mrf.mxu0 }
 0x21f   :  { %v1175_v17 = vadd.f32 %v1471_v15, %v1427_v13 }
 0x220   :  { %v1473_v18 = vpop.f32.mrf.mxu0 }
 0x221   :  { %v1180_v19 = vmax.f32 %v1175_v17, 0.0 }
 0x223   :  { %v1181_v20 = vpack.c.bf16 %v1180_v19, %v1180_v19 }
 0x225   :  { %1501 = vmatmul.mubr.bf16.vlgmr.msra.gmra.mxu1 %v1181_v20 }
 0x2e5   :  { %v1287_v22 = vpop.f32.mrf.mxu1 }
 0x2e6   :  { %v1288_v23 = vadd.f32 %v1444_v21, %v1287_v22 }
 0x2e7   :  { %v1502_v24 = vpop.f32.mrf.mxu1 }
 0x2e8   :  { %1293 = vst [vmem:[%s1910_s7] sm:$0xff] %v1288_v23 }
 0x2e9   :  { %v1290_v25 = vpop.f32.mrf.mxu1 }
 0x2eb   :  { %v1503_v26 = vpop.f32.mrf.mxu1 }
 0x2ec   :  { %1298 = vsyncpa [#allocation3], 1 }

</bundles_post_ra>
